<compile_context>
chip_gen: v5e
topology: v5e:2x2
jax: 0.10.0
libtpu: 0.0.40
codegen_flags: <defaults>
</compile_context>

<pallas_src>
import jax
import jax.numpy as jnp
from jax import lax
from jax.experimental import pallas as pl
from jax.experimental.pallas import tpu as pltpu


def _lstm_recurrence_kernel(maxlen_ref, gx_ref, whh_ref, len_ref,
                            h_out_ref, h_sc, c_sc):
    """Sequential LSTM recurrence over one (time-tile, batch-tile) block.

    maxlen_ref : (1,)        i32  SMEM  max(input_lengths) (scalar prefetch)
    gx_ref     : (tT, Bt, 4H) bf16 VMEM gates_x[t] = x_t @ W_ih^T + (b_ih+b_hh)
    whh_ref    : (H, 4H)     bf16 VMEM pre-transposed recurrent weight
    len_ref    : (Bt, 1)     i32  VMEM sequence lengths (padded rows = 0)
    h_out_ref  : (Bt, H)     f32  VMEM hidden state at last valid step
    h_sc, c_sc : (Bt, H)     f32  VMEM state accumulators across time tiles
    """
    t_tile = pl.program_id(1)
    tT = gx_ref.shape[0]
    Bt = gx_ref.shape[1]
    H = whh_ref.shape[0]
    t0 = t_tile * tT                         # global time offset of this tile

    @pl.when(t_tile == 0)
    def _init():
        h_sc[...] = jnp.zeros_like(h_sc)
        c_sc[...] = jnp.zeros_like(c_sc)

    # Skip whole tiles past the longest real sequence (pure wasted wall-clock
    # otherwise: the recurrence is strictly serial).
    @pl.when(t0 < maxlen_ref[0])
    def _run():
        w_hh = whh_ref[...]                                   # (H, 4H) bf16
        # Hoist the length broadcast out of the step loop (JAX doesn't CSE
        # broadcast_in_dim; unrolled steps would re-emit it).
        lens_b = jnp.broadcast_to(len_ref[...], (Bt, H))      # (Bt, H) i32

        def step(t, carry):
            h_prev, c_prev = carry
            # Only the recurrent matmul is on the serial path; bf16 operands,
            # f32 accumulation. gates_x is precomputed (bf16) and added in f32.
            gates = (gx_ref[t].astype(jnp.float32)
                     + jnp.dot(h_prev.astype(jnp.bfloat16), w_hh,
                               preferred_element_type=jnp.float32))
            # PyTorch gate order [i, f, g, o].  One full-width sigmoid over
            # (Bt, 4H), tanh only on the g slice (better lane utilization than
            # three sub-128-lane sigmoid calls when H < 128).
            sig = jax.nn.sigmoid(gates)
            i_g = sig[:, 0 * H:1 * H]
            f_g = sig[:, 1 * H:2 * H]
            o_g = sig[:, 3 * H:4 * H]
            g_g = jnp.tanh(gates[:, 2 * H:3 * H])
            c_new = f_g * c_prev + i_g * g_g
            h_new = o_g * jnp.tanh(c_new)
            # packed-sequence semantics: only advance while (t0+t) < length[b]
            mask = (t0 + t) < lens_b
            return (jnp.where(mask, h_new, h_prev),
                    jnp.where(mask, c_new, c_prev))

        h, c = lax.fori_loop(0, tT, step, (h_sc[...], c_sc[...]),
                             unroll=min(8, tT))
        h_sc[...] = h
        c_sc[...] = c

    # Cheap (Bt,H) store every tile; last write wins, HBM writeback happens
    # once per batch tile (output block index only depends on the batch axis).
    h_out_ref[...] = h_sc[...]


def _pick_batch_tile(Bp):
    """Largest multiple-of-16 divisor of Bp giving >=2 tiles (v7x megacore)."""
    best = Bp
    for bt in range(16, min(Bp, 128) + 1, 16):
        if Bp % bt == 0 and Bp // bt >= 2:
            best = bt
    return best


def _pick_time_tile(T, Bt, G, budget_bytes=8 << 20):
    """Time-tile size: double-buffered bf16 gates_x block fits the budget."""
    per_step = Bt * G * 2                     # bf16 bytes per timestep
    tT = max(1, budget_bytes // (2 * per_step))
    return int(min(T, tT, 64))


def lstm_model_forward(input_seq, input_lengths, params):
    """input_seq: (B, T) int32 token ids; input_lengths: (B,) int32."""
    emb = params["embeddings"]                       # (V, E)
    w_ih = params["w_ih"]                            # (4H, E)
    w_hh = params["w_hh"]                            # (4H, H)
    bias = params["b_ih"] + params["b_hh"]           # (4H,)
    w_fc, b_fc = params["w_fc"], params["b_fc"]      # (O, H), (O,)

    B, T = input_seq.shape
    H = w_hh.shape[1]
    G = 4 * H

    # --- hoisted, non-recurrent work (plain JAX / XLA) -----------------------
    # Embedding gather + input projection for all timesteps in ONE batched
    # matmul, emitted directly time-major (transpose the tiny id matrix, not
    # the activations).
    emb_tm = jnp.take(emb, input_seq.T, axis=0)                       # (T, B, E)
    gates_x = (jnp.einsum("tbe,ge->tbg", emb_tm, w_ih)
               + bias[None, None, :])                                 # (T, B, 4H) f32

    # Pad batch to a multiple of 16 (bf16 packs 2 rows per sublane); padded
    # rows get length 0 so their state stays zero and never affects real rows.
    Bp = max(16, ((B + 15) // 16) * 16)
    lens = input_lengths.astype(jnp.int32).reshape(B, 1)
    if Bp != B:
        gates_x = jnp.pad(gates_x, ((0, 0), (0, Bp - B), (0, 0)))
        lens = jnp.pad(lens, ((0, Bp - B), (0, 0)))

    # Tile sizes and grid.
    Bt = _pick_batch_tile(Bp)
    tT = _pick_time_tile(T, Bt, G)
    n_b = Bp // Bt
    n_t = pl.cdiv(T, tT)
    Tp = n_t * tT
    if Tp != T:
        gates_x = jnp.pad(gates_x, ((0, Tp - T), (0, 0), (0, 0)))

    # bf16 MXU operands (f32 accumulation happens in-kernel).
    gates_x = gates_x.astype(jnp.bfloat16)                            # (Tp, Bp, 4H)
    w_hh_t = w_hh.T.astype(jnp.bfloat16)                              # (H, 4H)

    # Scalar-prefetched serial bound: skip time tiles past max(input_lengths).
    maxlen = jnp.max(input_lengths).astype(jnp.int32).reshape(1)

    # VMEM footprint (double-buffered inputs/outputs + scratch) and explicit
    # limit, capped at v7x's 64 MiB physical VMEM.
    gx_block = tT * Bt * G * 2
    footprint = (2 * gx_block + 2 * H * G * 2 + 2 * Bt * H * 4
                 + 2 * Bt * 4 + 2 * Bt * H * 4)
    vmem_limit = int(min(max(2 * footprint + (4 << 20), 32 << 20), 64 << 20))

    h_last = pl.pallas_call(
        _lstm_recurrence_kernel,
        out_shape=jax.ShapeDtypeStruct((Bp, H), jnp.float32),
        grid_spec=pltpu.PrefetchScalarGridSpec(
            num_scalar_prefetch=1,
            grid=(n_b, n_t),
            in_specs=[
                pl.BlockSpec((tT, Bt, G), lambda b, t, ml: (t, b, 0)),  # gates_x
                pl.BlockSpec((H, G), lambda b, t, ml: (0, 0)),          # W_hh^T
                pl.BlockSpec((Bt, 1), lambda b, t, ml: (b, 0)),         # lengths
            ],
            out_specs=pl.BlockSpec((Bt, H), lambda b, t, ml: (b, 0)),
            scratch_shapes=[
                pltpu.VMEM((Bt, H), jnp.float32),   # h state
                pltpu.VMEM((Bt, H), jnp.float32),   # c state
            ],
        ),
        compiler_params=pltpu.CompilerParams(
            dimension_semantics=("parallel", "arbitrary"),
            vmem_limit_bytes=vmem_limit),
    )(maxlen, gates_x, w_hh_t, lens)

    h_last = h_last[:B]                               # drop batch padding
    # Final Linear hoisted out of the kernel (O is tiny; lane-masked stores
    # inside the kernel would cost more than this one XLA matmul).
    return h_last @ w_fc.T + b_fc[None, :]


def _reference_forward(input_seq, input_lengths, params):
    """Pure-JAX f32 reference with identical semantics (for validation)."""
    emb = params["embeddings"]
    w_ih, w_hh = params["w_ih"], params["w_hh"]
    b = params["b_ih"] + params["b_hh"]
    w_fc, b_fc = params["w_fc"], params["b_fc"]
    H = w_hh.shape[1]

    x = jnp.take(emb, input_seq, axis=0)              # (B, T, E)
    B, T, _ = x.shape
    h = jnp.zeros((B, H), jnp.float32)
    c = jnp.zeros((B, H), jnp.float32)
    for t in range(T):
        gates = x[:, t, :] @ w_ih.T + h @ w_hh.T + b
        i = jax.nn.sigmoid(gates[:, 0 * H:1 * H])
        f = jax.nn.sigmoid(gates[:, 1 * H:2 * H])
        g = jnp.tanh(gates[:, 2 * H:3 * H])
        o = jax.nn.sigmoid(gates[:, 3 * H:4 * H])
        c_new = f * c + i * g
        h_new = o * jnp.tanh(c_new)
        mask = (t < input_lengths)[:, None]
        h = jnp.where(mask, h_new, h)
        c = jnp.where(mask, c_new, c)
    return h @ w_fc.T + b_fc


if __name__ == "__main__":
    # small shapes consistent with the module's forward
    VOCAB, INPUT_SIZE, HIDDEN_SIZE, OUTPUT_SIZE = 32, 16, 32, 8
    B, T = 4, 8

    key = jax.random.PRNGKey(0)
    k_emb, k_wih, k_whh, k_bih, k_bhh, k_wfc, k_bfc, k_seq = jax.random.split(key, 8)

    params = {
        "embeddings": jax.random.normal(k_emb, (VOCAB, INPUT_SIZE), jnp.float32) * 0.5,
        "w_ih": jax.random.normal(k_wih, (4 * HIDDEN_SIZE, INPUT_SIZE), jnp.float32) * 0.1,
        "w_hh": jax.random.normal(k_whh, (4 * HIDDEN_SIZE, HIDDEN_SIZE), jnp.float32) * 0.1,
        "b_ih": jax.random.normal(k_bih, (4 * HIDDEN_SIZE,), jnp.float32) * 0.1,
        "b_hh": jax.random.normal(k_bhh, (4 * HIDDEN_SIZE,), jnp.float32) * 0.1,
        "w_fc": jax.random.normal(k_wfc, (OUTPUT_SIZE, HIDDEN_SIZE), jnp.float32) * 0.1,
        "b_fc": jax.random.normal(k_bfc, (OUTPUT_SIZE,), jnp.float32) * 0.1,
    }

    input_seq = jax.random.randint(k_seq, (B, T), 0, VOCAB, dtype=jnp.int32)
    input_lengths = jnp.array([8, 5, 3, 6], dtype=jnp.int32)

    out = lstm_model_forward(input_seq, input_lengths, params)
    out = jax.block_until_ready(out)

    ref = _reference_forward(input_seq, input_lengths, params)
    assert out.shape == (B, OUTPUT_SIZE)
    # bf16 matmul operands (f32 accumulation) vs pure-f32 reference: loosened
    # tolerance; drift over these short sequences is well within 1e-2.
    assert jnp.allclose(out, ref, atol=2e-2, rtol=2e-2), "mismatch vs reference"

    print("KERNEL_OK")
</pallas_src>

<mosaic_0001>
module attributes {stable_mosaic.version = 11 : i64} {
  func.func @_lstm_recurrence_kernel(%arg0: i32, %arg1: i32, %arg2: memref<1xi32, #tpu.memory_space<smem>>, %arg3: memref<8x16x128xbf16, #tpu.memory_space<vmem>>, %arg4: memref<32x128xbf16, #tpu.memory_space<vmem>>, %arg5: memref<16x1xi32, #tpu.memory_space<vmem>>, %arg6: memref<16x32xf32, #tpu.memory_space<vmem>>, %arg7: memref<16x32xf32, #tpu.memory_space<vmem>>, %arg8: memref<16x32xf32, #tpu.memory_space<vmem>>) attributes {dimension_semantics = [#tpu.dimension_semantics<parallel>, #tpu.dimension_semantics<arbitrary>], iteration_bounds = array<i64: 1, 1>, scalar_prefetch = 1 : i64, scratch_operands = 2 : i64, tpu.core_type = #tpu.core_type<tc>, window_params = [{transform_indices = @transform_0, window_bounds = array<i64: 8, 16, 128>}, {pipeline_mode = #tpu.pipeline_mode<synchronous>, transform_indices = @transform_1, window_bounds = array<i64: 32, 128>}, {transform_indices = @transform_2, window_bounds = array<i64: 16, 1>}, {transform_indices = @transform_3, window_bounds = array<i64: 16, 32>}]} {
    %c8_i32 = arith.constant 8 : i32
    %0 = arith.muli %arg1, %c8_i32 : i32
    %c0_i32 = arith.constant 0 : i32
    %1 = arith.cmpi eq, %arg1, %c0_i32 : i32
    %2 = arith.extui %1 : i1 to i32
    %c0_i32_0 = arith.constant 0 : i32
    %3 = arith.cmpi ne, %2, %c0_i32_0 : i32
    scf.if %3 {
      %cst = arith.constant 0.000000e+00 : f32
      %10 = vector.broadcast %cst : f32 to vector<16x32xf32>
      %c0_6 = arith.constant 0 : index
      %c0_7 = arith.constant 0 : index
      %11 = vector.load %arg7[%c0_6, %c0_7] : memref<16x32xf32, #tpu.memory_space<vmem>>, vector<16x32xf32>
      tpu.vector_store %arg7[%c0_6, %c0_7], %10 {strides = array<i32>} : memref<16x32xf32, #tpu.memory_space<vmem>>, vector<16x32xf32>,
      %cst_8 = arith.constant 0.000000e+00 : f32
      %12 = vector.broadcast %cst_8 : f32 to vector<16x32xf32>
      %c0_9 = arith.constant 0 : index
      %c0_10 = arith.constant 0 : index
      %13 = vector.load %arg8[%c0_9, %c0_10] : memref<16x32xf32, #tpu.memory_space<vmem>>, vector<16x32xf32>
      tpu.vector_store %arg8[%c0_9, %c0_10], %12 {strides = array<i32>} : memref<16x32xf32, #tpu.memory_space<vmem>>, vector<16x32xf32>,
    } else {
    }
    %c0 = arith.constant 0 : index
    %4 = memref.load %arg2[%c0] : memref<1xi32, #tpu.memory_space<smem>>
    %5 = arith.cmpi slt, %0, %4 : i32
    %6 = arith.extui %5 : i1 to i32
    %c0_i32_1 = arith.constant 0 : i32
    %7 = arith.cmpi ne, %6, %c0_i32_1 : i32
    scf.if %7 {
      %c0_6 = arith.constant 0 : index
      %c0_7 = arith.constant 0 : index
      %10 = vector.load %arg4[%c0_6, %c0_7] : memref<32x128xbf16, #tpu.memory_space<vmem>>, vector<32x128xbf16>
      %c0_8 = arith.constant 0 : index
      %c0_9 = arith.constant 0 : index
      %11 = vector.load %arg5[%c0_8, %c0_9] : memref<16x1xi32, #tpu.memory_space<vmem>>, vector<16x1xi32>
      %12 = vector.shape_cast %11 : vector<16x1xi32> to vector<16x1xi32>
      %13 = vector.broadcast %12 : vector<16x1xi32> to vector<16x32xi32>
      %c0_10 = arith.constant 0 : index
      %c0_11 = arith.constant 0 : index
      %14 = vector.load %arg7[%c0_10, %c0_11] : memref<16x32xf32, #tpu.memory_space<vmem>>, vector<16x32xf32>
      %c0_12 = arith.constant 0 : index
      %c0_13 = arith.constant 0 : index
      %15 = vector.load %arg8[%c0_12, %c0_13] : memref<16x32xf32, #tpu.memory_space<vmem>>, vector<16x32xf32>
      %c0_i32_14 = arith.constant 0 : i32
      %16 = arith.index_cast %c0_i32_14 : i32 to index
      %c0_15 = arith.constant 0 : index
      %c0_16 = arith.constant 0 : index
      %17 = vector.load %arg3[%16, %c0_15, %c0_16] : memref<8x16x128xbf16, #tpu.memory_space<vmem>>, vector<1x16x128xbf16>
      %18 = vector.shape_cast %17 : vector<1x16x128xbf16> to vector<16x128xbf16>
      %19 = arith.extf %18 : vector<16x128xbf16> to vector<16x128xf32>
      %20 = arith.truncf %14 : vector<16x32xf32> to vector<16x32xbf16>
      %cst = arith.constant dense<0.000000e+00> : vector<16x128xf32>
      %21 = tpu.matmul %20, %10, %cst {dimension_numbers = #tpu.dot_dimension_numbers<[1], [0], [0], [1], [0, 0, 1, 1], [], []>} : vector<16x32xbf16>, vector<32x128xbf16>, vector<16x128xf32> -> vector<16x128xf32>
      %22 = arith.addf %19, %21 : vector<16x128xf32>
      %23 = arith.negf %22 : vector<16x128xf32>
      %24 = math.exp %23 : vector<16x128xf32>
      %cst_17 = arith.constant 1.000000e+00 : f32
      %25 = vector.broadcast %cst_17 : f32 to vector<16x128xf32>
      %26 = arith.addf %25, %24 : vector<16x128xf32>
      %27 = arith.divf %25, %26 : vector<16x128xf32>
      %28 = vector.extract_strided_slice %27 {offsets = [0, 0], sizes = [16, 32], strides = [1, 1]} : vector<16x128xf32> to vector<16x32xf32>
      %29 = vector.extract_strided_slice %27 {offsets = [0, 32], sizes = [16, 32], strides = [1, 1]} : vector<16x128xf32> to vector<16x32xf32>
      %30 = vector.extract_strided_slice %27 {offsets = [0, 96], sizes = [16, 32], strides = [1, 1]} : vector<16x128xf32> to vector<16x32xf32>
      %31 = vector.extract_strided_slice %22 {offsets = [0, 64], sizes = [16, 32], strides = [1, 1]} : vector<16x128xf32> to vector<16x32xf32>
      %32 = math.tanh %31 : vector<16x32xf32>
      %33 = arith.mulf %29, %15 : vector<16x32xf32>
      %34 = arith.mulf %28, %32 : vector<16x32xf32>
      %35 = arith.addf %33, %34 : vector<16x32xf32>
      %36 = math.tanh %35 : vector<16x32xf32>
      %37 = arith.mulf %30, %36 : vector<16x32xf32>
      %38 = arith.addi %0, %c0_i32_14 : i32
      %39 = vector.broadcast %38 : i32 to vector<16x32xi32>
      %40 = arith.cmpi slt, %39, %13 : vector<16x32xi32>
      %41 = arith.select %40, %37, %14 : vector<16x32xi1>, vector<16x32xf32>
      %42 = arith.select %40, %35, %15 : vector<16x32xi1>, vector<16x32xf32>
      %c1_i32 = arith.constant 1 : i32
      %43 = arith.index_cast %c1_i32 : i32 to index
      %c0_18 = arith.constant 0 : index
      %c0_19 = arith.constant 0 : index
      %44 = vector.load %arg3[%43, %c0_18, %c0_19] : memref<8x16x128xbf16, #tpu.memory_space<vmem>>, vector<1x16x128xbf16>
      %45 = vector.shape_cast %44 : vector<1x16x128xbf16> to vector<16x128xbf16>
      %46 = arith.extf %45 : vector<16x128xbf16> to vector<16x128xf32>
      %47 = arith.truncf %41 : vector<16x32xf32> to vector<16x32xbf16>
      %cst_20 = arith.constant dense<0.000000e+00> : vector<16x128xf32>
      %48 = tpu.matmul %47, %10, %cst_20 {dimension_numbers = #tpu.dot_dimension_numbers<[1], [0], [0], [1], [0, 0, 1, 1], [], []>} : vector<16x32xbf16>, vector<32x128xbf16>, vector<16x128xf32> -> vector<16x128xf32>
      %49 = arith.addf %46, %48 : vector<16x128xf32>
      %50 = arith.negf %49 : vector<16x128xf32>
      %51 = math.exp %50 : vector<16x128xf32>
      %cst_21 = arith.constant 1.000000e+00 : f32
      %52 = vector.broadcast %cst_21 : f32 to vector<16x128xf32>
      %53 = arith.addf %52, %51 : vector<16x128xf32>
      %54 = arith.divf %52, %53 : vector<16x128xf32>
      %55 = vector.extract_strided_slice %54 {offsets = [0, 0], sizes = [16, 32], strides = [1, 1]} : vector<16x128xf32> to vector<16x32xf32>
      %56 = vector.extract_strided_slice %54 {offsets = [0, 32], sizes = [16, 32], strides = [1, 1]} : vector<16x128xf32> to vector<16x32xf32>
      %57 = vector.extract_strided_slice %54 {offsets = [0, 96], sizes = [16, 32], strides = [1, 1]} : vector<16x128xf32> to vector<16x32xf32>
      %58 = vector.extract_strided_slice %49 {offsets = [0, 64], sizes = [16, 32], strides = [1, 1]} : vector<16x128xf32> to vector<16x32xf32>
      %59 = math.tanh %58 : vector<16x32xf32>
      %60 = arith.mulf %56, %42 : vector<16x32xf32>
      %61 = arith.mulf %55, %59 : vector<16x32xf32>
      %62 = arith.addf %60, %61 : vector<16x32xf32>
      %63 = math.tanh %62 : vector<16x32xf32>
      %64 = arith.mulf %57, %63 : vector<16x32xf32>
      %65 = arith.addi %0, %c1_i32 : i32
      %66 = vector.broadcast %65 : i32 to vector<16x32xi32>
      %67 = arith.cmpi slt, %66, %13 : vector<16x32xi32>
      %68 = arith.select %67, %64, %41 : vector<16x32xi1>, vector<16x32xf32>
      %69 = arith.select %67, %62, %42 : vector<16x32xi1>, vector<16x32xf32>
      %c2_i32 = arith.constant 2 : i32
      %70 = arith.index_cast %c2_i32 : i32 to index
      %c0_22 = arith.constant 0 : index
      %c0_23 = arith.constant 0 : index
      %71 = vector.load %arg3[%70, %c0_22, %c0_23] : memref<8x16x128xbf16, #tpu.memory_space<vmem>>, vector<1x16x128xbf16>
      %72 = vector.shape_cast %71 : vector<1x16x128xbf16> to vector<16x128xbf16>
      %73 = arith.extf %72 : vector<16x128xbf16> to vector<16x128xf32>
      %74 = arith.truncf %68 : vector<16x32xf32> to vector<16x32xbf16>
      %cst_24 = arith.constant dense<0.000000e+00> : vector<16x128xf32>
      %75 = tpu.matmul %74, %10, %cst_24 {dimension_numbers = #tpu.dot_dimension_numbers<[1], [0], [0], [1], [0, 0, 1, 1], [], []>} : vector<16x32xbf16>, vector<32x128xbf16>, vector<16x128xf32> -> vector<16x128xf32>
      %76 = arith.addf %73, %75 : vector<16x128xf32>
      %77 = arith.negf %76 : vector<16x128xf32>
      %78 = math.exp %77 : vector<16x128xf32>
      %cst_25 = arith.constant 1.000000e+00 : f32
      %79 = vector.broadcast %cst_25 : f32 to vector<16x128xf32>
      %80 = arith.addf %79, %78 : vector<16x128xf32>
      %81 = arith.divf %79, %80 : vector<16x128xf32>
      %82 = vector.extract_strided_slice %81 {offsets = [0, 0], sizes = [16, 32], strides = [1, 1]} : vector<16x128xf32> to vector<16x32xf32>
      %83 = vector.extract_strided_slice %81 {offsets = [0, 32], sizes = [16, 32], strides = [1, 1]} : vector<16x128xf32> to vector<16x32xf32>
      %84 = vector.extract_strided_slice %81 {offsets = [0, 96], sizes = [16, 32], strides = [1, 1]} : vector<16x128xf32> to vector<16x32xf32>
      %85 = vector.extract_strided_slice %76 {offsets = [0, 64], sizes = [16, 32], strides = [1, 1]} : vector<16x128xf32> to vector<16x32xf32>
      %86 = math.tanh %85 : vector<16x32xf32>
      %87 = arith.mulf %83, %69 : vector<16x32xf32>
      %88 = arith.mulf %82, %86 : vector<16x32xf32>
      %89 = arith.addf %87, %88 : vector<16x32xf32>
      %90 = math.tanh %89 : vector<16x32xf32>
      %91 = arith.mulf %84, %90 : vector<16x32xf32>
      %92 = arith.addi %0, %c2_i32 : i32
      %93 = vector.broadcast %92 : i32 to vector<16x32xi32>
      %94 = arith.cmpi slt, %93, %13 : vector<16x32xi32>
      %95 = arith.select %94, %91, %68 : vector<16x32xi1>, vector<16x32xf32>
      %96 = arith.select %94, %89, %69 : vector<16x32xi1>, vector<16x32xf32>
      %c3_i32 = arith.constant 3 : i32
      %97 = arith.index_cast %c3_i32 : i32 to index
      %c0_26 = arith.constant 0 : index
      %c0_27 = arith.constant 0 : index
      %98 = vector.load %arg3[%97, %c0_26, %c0_27] : memref<8x16x128xbf16, #tpu.memory_space<vmem>>, vector<1x16x128xbf16>
      %99 = vector.shape_cast %98 : vector<1x16x128xbf16> to vector<16x128xbf16>
      %100 = arith.extf %99 : vector<16x128xbf16> to vector<16x128xf32>
      %101 = arith.truncf %95 : vector<16x32xf32> to vector<16x32xbf16>
      %cst_28 = arith.constant dense<0.000000e+00> : vector<16x128xf32>
      %102 = tpu.matmul %101, %10, %cst_28 {dimension_numbers = #tpu.dot_dimension_numbers<[1], [0], [0], [1], [0, 0, 1, 1], [], []>} : vector<16x32xbf16>, vector<32x128xbf16>, vector<16x128xf32> -> vector<16x128xf32>
      %103 = arith.addf %100, %102 : vector<16x128xf32>
      %104 = arith.negf %103 : vector<16x128xf32>
      %105 = math.exp %104 : vector<16x128xf32>
      %cst_29 = arith.constant 1.000000e+00 : f32
      %106 = vector.broadcast %cst_29 : f32 to vector<16x128xf32>
      %107 = arith.addf %106, %105 : vector<16x128xf32>
      %108 = arith.divf %106, %107 : vector<16x128xf32>
      %109 = vector.extract_strided_slice %108 {offsets = [0, 0], sizes = [16, 32], strides = [1, 1]} : vector<16x128xf32> to vector<16x32xf32>
      %110 = vector.extract_strided_slice %108 {offsets = [0, 32], sizes = [16, 32], strides = [1, 1]} : vector<16x128xf32> to vector<16x32xf32>
      %111 = vector.extract_strided_slice %108 {offsets = [0, 96], sizes = [16, 32], strides = [1, 1]} : vector<16x128xf32> to vector<16x32xf32>
      %112 = vector.extract_strided_slice %103 {offsets = [0, 64], sizes = [16, 32], strides = [1, 1]} : vector<16x128xf32> to vector<16x32xf32>
      %113 = math.tanh %112 : vector<16x32xf32>
      %114 = arith.mulf %110, %96 : vector<16x32xf32>
      %115 = arith.mulf %109, %113 : vector<16x32xf32>
      %116 = arith.addf %114, %115 : vector<16x32xf32>
      %117 = math.tanh %116 : vector<16x32xf32>
      %118 = arith.mulf %111, %117 : vector<16x32xf32>
      %119 = arith.addi %0, %c3_i32 : i32
      %120 = vector.broadcast %119 : i32 to vector<16x32xi32>
      %121 = arith.cmpi slt, %120, %13 : vector<16x32xi32>
      %122 = arith.select %121, %118, %95 : vector<16x32xi1>, vector<16x32xf32>
      %123 = arith.select %121, %116, %96 : vector<16x32xi1>, vector<16x32xf32>
      %c4_i32 = arith.constant 4 : i32
      %124 = arith.index_cast %c4_i32 : i32 to index
      %c0_30 = arith.constant 0 : index
      %c0_31 = arith.constant 0 : index
      %125 = vector.load %arg3[%124, %c0_30, %c0_31] : memref<8x16x128xbf16, #tpu.memory_space<vmem>>, vector<1x16x128xbf16>
      %126 = vector.shape_cast %125 : vector<1x16x128xbf16> to vector<16x128xbf16>
      %127 = arith.extf %126 : vector<16x128xbf16> to vector<16x128xf32>
      %128 = arith.truncf %122 : vector<16x32xf32> to vector<16x32xbf16>
      %cst_32 = arith.constant dense<0.000000e+00> : vector<16x128xf32>
      %129 = tpu.matmul %128, %10, %cst_32 {dimension_numbers = #tpu.dot_dimension_numbers<[1], [0], [0], [1], [0, 0, 1, 1], [], []>} : vector<16x32xbf16>, vector<32x128xbf16>, vector<16x128xf32> -> vector<16x128xf32>
      %130 = arith.addf %127, %129 : vector<16x128xf32>
      %131 = arith.negf %130 : vector<16x128xf32>
      %132 = math.exp %131 : vector<16x128xf32>
      %cst_33 = arith.constant 1.000000e+00 : f32
      %133 = vector.broadcast %cst_33 : f32 to vector<16x128xf32>
      %134 = arith.addf %133, %132 : vector<16x128xf32>
      %135 = arith.divf %133, %134 : vector<16x128xf32>
      %136 = vector.extract_strided_slice %135 {offsets = [0, 0], sizes = [16, 32], strides = [1, 1]} : vector<16x128xf32> to vector<16x32xf32>
      %137 = vector.extract_strided_slice %135 {offsets = [0, 32], sizes = [16, 32], strides = [1, 1]} : vector<16x128xf32> to vector<16x32xf32>
      %138 = vector.extract_strided_slice %135 {offsets = [0, 96], sizes = [16, 32], strides = [1, 1]} : vector<16x128xf32> to vector<16x32xf32>
      %139 = vector.extract_strided_slice %130 {offsets = [0, 64], sizes = [16, 32], strides = [1, 1]} : vector<16x128xf32> to vector<16x32xf32>
      %140 = math.tanh %139 : vector<16x32xf32>
      %141 = arith.mulf %137, %123 : vector<16x32xf32>
      %142 = arith.mulf %136, %140 : vector<16x32xf32>
      %143 = arith.addf %141, %142 : vector<16x32xf32>
      %144 = math.tanh %143 : vector<16x32xf32>
      %145 = arith.mulf %138, %144 : vector<16x32xf32>
      %146 = arith.addi %0, %c4_i32 : i32
      %147 = vector.broadcast %146 : i32 to vector<16x32xi32>
      %148 = arith.cmpi slt, %147, %13 : vector<16x32xi32>
      %149 = arith.select %148, %145, %122 : vector<16x32xi1>, vector<16x32xf32>
      %150 = arith.select %148, %143, %123 : vector<16x32xi1>, vector<16x32xf32>
      %c5_i32 = arith.constant 5 : i32
      %151 = arith.index_cast %c5_i32 : i32 to index
      %c0_34 = arith.constant 0 : index
      %c0_35 = arith.constant 0 : index
      %152 = vector.load %arg3[%151, %c0_34, %c0_35] : memref<8x16x128xbf16, #tpu.memory_space<vmem>>, vector<1x16x128xbf16>
      %153 = vector.shape_cast %152 : vector<1x16x128xbf16> to vector<16x128xbf16>
      %154 = arith.extf %153 : vector<16x128xbf16> to vector<16x128xf32>
      %155 = arith.truncf %149 : vector<16x32xf32> to vector<16x32xbf16>
      %cst_36 = arith.constant dense<0.000000e+00> : vector<16x128xf32>
      %156 = tpu.matmul %155, %10, %cst_36 {dimension_numbers = #tpu.dot_dimension_numbers<[1], [0], [0], [1], [0, 0, 1, 1], [], []>} : vector<16x32xbf16>, vector<32x128xbf16>, vector<16x128xf32> -> vector<16x128xf32>
      %157 = arith.addf %154, %156 : vector<16x128xf32>
      %158 = arith.negf %157 : vector<16x128xf32>
      %159 = math.exp %158 : vector<16x128xf32>
      %cst_37 = arith.constant 1.000000e+00 : f32
      %160 = vector.broadcast %cst_37 : f32 to vector<16x128xf32>
      %161 = arith.addf %160, %159 : vector<16x128xf32>
      %162 = arith.divf %160, %161 : vector<16x128xf32>
      %163 = vector.extract_strided_slice %162 {offsets = [0, 0], sizes = [16, 32], strides = [1, 1]} : vector<16x128xf32> to vector<16x32xf32>
      %164 = vector.extract_strided_slice %162 {offsets = [0, 32], sizes = [16, 32], strides = [1, 1]} : vector<16x128xf32> to vector<16x32xf32>
      %165 = vector.extract_strided_slice %162 {offsets = [0, 96], sizes = [16, 32], strides = [1, 1]} : vector<16x128xf32> to vector<16x32xf32>
      %166 = vector.extract_strided_slice %157 {offsets = [0, 64], sizes = [16, 32], strides = [1, 1]} : vector<16x128xf32> to vector<16x32xf32>
      %167 = math.tanh %166 : vector<16x32xf32>
      %168 = arith.mulf %164, %150 : vector<16x32xf32>
      %169 = arith.mulf %163, %167 : vector<16x32xf32>
      %170 = arith.addf %168, %169 : vector<16x32xf32>
      %171 = math.tanh %170 : vector<16x32xf32>
      %172 = arith.mulf %165, %171 : vector<16x32xf32>
      %173 = arith.addi %0, %c5_i32 : i32
      %174 = vector.broadcast %173 : i32 to vector<16x32xi32>
      %175 = arith.cmpi slt, %174, %13 : vector<16x32xi32>
      %176 = arith.select %175, %172, %149 : vector<16x32xi1>, vector<16x32xf32>
      %177 = arith.select %175, %170, %150 : vector<16x32xi1>, vector<16x32xf32>
      %c6_i32 = arith.constant 6 : i32
      %178 = arith.index_cast %c6_i32 : i32 to index
      %c0_38 = arith.constant 0 : index
      %c0_39 = arith.constant 0 : index
      %179 = vector.load %arg3[%178, %c0_38, %c0_39] : memref<8x16x128xbf16, #tpu.memory_space<vmem>>, vector<1x16x128xbf16>
      %180 = vector.shape_cast %179 : vector<1x16x128xbf16> to vector<16x128xbf16>
      %181 = arith.extf %180 : vector<16x128xbf16> to vector<16x128xf32>
      %182 = arith.truncf %176 : vector<16x32xf32> to vector<16x32xbf16>
      %cst_40 = arith.constant dense<0.000000e+00> : vector<16x128xf32>
      %183 = tpu.matmul %182, %10, %cst_40 {dimension_numbers = #tpu.dot_dimension_numbers<[1], [0], [0], [1], [0, 0, 1, 1], [], []>} : vector<16x32xbf16>, vector<32x128xbf16>, vector<16x128xf32> -> vector<16x128xf32>
      %184 = arith.addf %181, %183 : vector<16x128xf32>
      %185 = arith.negf %184 : vector<16x128xf32>
      %186 = math.exp %185 : vector<16x128xf32>
      %cst_41 = arith.constant 1.000000e+00 : f32
      %187 = vector.broadcast %cst_41 : f32 to vector<16x128xf32>
      %188 = arith.addf %187, %186 : vector<16x128xf32>
      %189 = arith.divf %187, %188 : vector<16x128xf32>
      %190 = vector.extract_strided_slice %189 {offsets = [0, 0], sizes = [16, 32], strides = [1, 1]} : vector<16x128xf32> to vector<16x32xf32>
      %191 = vector.extract_strided_slice %189 {offsets = [0, 32], sizes = [16, 32], strides = [1, 1]} : vector<16x128xf32> to vector<16x32xf32>
      %192 = vector.extract_strided_slice %189 {offsets = [0, 96], sizes = [16, 32], strides = [1, 1]} : vector<16x128xf32> to vector<16x32xf32>
      %193 = vector.extract_strided_slice %184 {offsets = [0, 64], sizes = [16, 32], strides = [1, 1]} : vector<16x128xf32> to vector<16x32xf32>
      %194 = math.tanh %193 : vector<16x32xf32>
      %195 = arith.mulf %191, %177 : vector<16x32xf32>
      %196 = arith.mulf %190, %194 : vector<16x32xf32>
      %197 = arith.addf %195, %196 : vector<16x32xf32>
      %198 = math.tanh %197 : vector<16x32xf32>
      %199 = arith.mulf %192, %198 : vector<16x32xf32>
      %200 = arith.addi %0, %c6_i32 : i32
      %201 = vector.broadcast %200 : i32 to vector<16x32xi32>
      %202 = arith.cmpi slt, %201, %13 : vector<16x32xi32>
      %203 = arith.select %202, %199, %176 : vector<16x32xi1>, vector<16x32xf32>
      %204 = arith.select %202, %197, %177 : vector<16x32xi1>, vector<16x32xf32>
      %c7_i32 = arith.constant 7 : i32
      %205 = arith.index_cast %c7_i32 : i32 to index
      %c0_42 = arith.constant 0 : index
      %c0_43 = arith.constant 0 : index
      %206 = vector.load %arg3[%205, %c0_42, %c0_43] : memref<8x16x128xbf16, #tpu.memory_space<vmem>>, vector<1x16x128xbf16>
      %207 = vector.shape_cast %206 : vector<1x16x128xbf16> to vector<16x128xbf16>
      %208 = arith.extf %207 : vector<16x128xbf16> to vector<16x128xf32>
      %209 = arith.truncf %203 : vector<16x32xf32> to vector<16x32xbf16>
      %cst_44 = arith.constant dense<0.000000e+00> : vector<16x128xf32>
      %210 = tpu.matmul %209, %10, %cst_44 {dimension_numbers = #tpu.dot_dimension_numbers<[1], [0], [0], [1], [0, 0, 1, 1], [], []>} : vector<16x32xbf16>, vector<32x128xbf16>, vector<16x128xf32> -> vector<16x128xf32>
      %211 = arith.addf %208, %210 : vector<16x128xf32>
      %212 = arith.negf %211 : vector<16x128xf32>
      %213 = math.exp %212 : vector<16x128xf32>
      %cst_45 = arith.constant 1.000000e+00 : f32
      %214 = vector.broadcast %cst_45 : f32 to vector<16x128xf32>
      %215 = arith.addf %214, %213 : vector<16x128xf32>
      %216 = arith.divf %214, %215 : vector<16x128xf32>
      %217 = vector.extract_strided_slice %216 {offsets = [0, 0], sizes = [16, 32], strides = [1, 1]} : vector<16x128xf32> to vector<16x32xf32>
      %218 = vector.extract_strided_slice %216 {offsets = [0, 32], sizes = [16, 32], strides = [1, 1]} : vector<16x128xf32> to vector<16x32xf32>
      %219 = vector.extract_strided_slice %216 {offsets = [0, 96], sizes = [16, 32], strides = [1, 1]} : vector<16x128xf32> to vector<16x32xf32>
      %220 = vector.extract_strided_slice %211 {offsets = [0, 64], sizes = [16, 32], strides = [1, 1]} : vector<16x128xf32> to vector<16x32xf32>
      %221 = math.tanh %220 : vector<16x32xf32>
      %222 = arith.mulf %218, %204 : vector<16x32xf32>
      %223 = arith.mulf %217, %221 : vector<16x32xf32>
      %224 = arith.addf %222, %223 : vector<16x32xf32>
      %225 = math.tanh %224 : vector<16x32xf32>
      %226 = arith.mulf %219, %225 : vector<16x32xf32>
      %227 = arith.addi %0, %c7_i32 : i32
      %228 = vector.broadcast %227 : i32 to vector<16x32xi32>
      %229 = arith.cmpi slt, %228, %13 : vector<16x32xi32>
      %230 = arith.select %229, %226, %203 : vector<16x32xi1>, vector<16x32xf32>
      %231 = arith.select %229, %224, %204 : vector<16x32xi1>, vector<16x32xf32>
      %c8_i32_46 = arith.constant 8 : i32
      %c0_47 = arith.constant 0 : index
      %c0_48 = arith.constant 0 : index
      %232 = vector.load %arg7[%c0_47, %c0_48] : memref<16x32xf32, #tpu.memory_space<vmem>>, vector<16x32xf32>
      tpu.vector_store %arg7[%c0_47, %c0_48], %230 {strides = array<i32>} : memref<16x32xf32, #tpu.memory_space<vmem>>, vector<16x32xf32>,
      %c0_49 = arith.constant 0 : index
      %c0_50 = arith.constant 0 : index
      %233 = vector.load %arg8[%c0_49, %c0_50] : memref<16x32xf32, #tpu.memory_space<vmem>>, vector<16x32xf32>
      tpu.vector_store %arg8[%c0_49, %c0_50], %231 {strides = array<i32>} : memref<16x32xf32, #tpu.memory_space<vmem>>, vector<16x32xf32>,
    } else {
    }
    %c0_2 = arith.constant 0 : index
    %c0_3 = arith.constant 0 : index
    %8 = vector.load %arg7[%c0_2, %c0_3] : memref<16x32xf32, #tpu.memory_space<vmem>>, vector<16x32xf32>
    %c0_4 = arith.constant 0 : index
    %c0_5 = arith.constant 0 : index
    %9 = vector.load %arg6[%c0_4, %c0_5] : memref<16x32xf32, #tpu.memory_space<vmem>>, vector<16x32xf32>
    tpu.vector_store %arg6[%c0_4, %c0_5], %8 {strides = array<i32>} : memref<16x32xf32, #tpu.memory_space<vmem>>, vector<16x32xf32>,
    return
  }
  func.func @transform_0(%arg0: i32, %arg1: i32, %arg2: memref<1xi32, #tpu.memory_space<smem>>) -> (i32, i32, i32) {
    %c0_i32 = arith.constant 0 : i32
    %c0_i32_0 = arith.constant 0 : i32
    return %arg1, %arg0, %c0_i32 : i32, i32, i32
  }
  func.func @transform_1(%arg0: i32, %arg1: i32, %arg2: memref<1xi32, #tpu.memory_space<smem>>) -> (i32, i32) {
    %c0_i32 = arith.constant 0 : i32
    %c0_i32_0 = arith.constant 0 : i32
    %c0_i32_1 = arith.constant 0 : i32
    return %c0_i32, %c0_i32_0 : i32, i32
  }
  func.func @transform_2(%arg0: i32, %arg1: i32, %arg2: memref<1xi32, #tpu.memory_space<smem>>) -> (i32, i32) {
    %c0_i32 = arith.constant 0 : i32
    %c0_i32_0 = arith.constant 0 : i32
    return %arg0, %c0_i32 : i32, i32
  }
  func.func @transform_3(%arg0: i32, %arg1: i32, %arg2: memref<1xi32, #tpu.memory_space<smem>>) -> (i32, i32) {
    %c0_i32 = arith.constant 0 : i32
    %c0_i32_0 = arith.constant 0 : i32
    return %arg0, %c0_i32 : i32, i32
  }
}

</mosaic_0001>

<bundles_post_ra>
// kernel: tpu_custom_call.1
= control target key start
LH: loop header
LB: loop body
LE: loop exit
PB: predicated region body
PF: predicated region fallthrough
CT: control target
= control target key end

     0   :  { %10 = vsyncpa [#allocation7], 0  ;;  %s1680_s0 = inlined_call_operand.<no memory space> [shape: s32[1], index: 0, kind: input, shape index: {}]   ;;  %s1681_s1 = inlined_call_operand.hbm [shape: bf16[8,16,128], index: 1, kind: input, shape index: {}]   ;;  %s1682_s2 = inlined_call_operand.vmem [shape: bf16[32,128], index: 2, kind: input, shape index: {}]   ;;  %s1683_s3 = inlined_call_operand.vmem [shape: s32[16,1], index: 3, kind: input, shape index: {}]   ;;  %s1684_s4 = inlined_call_operand.hbm [shape: f32[16,32], index: 4, kind: output, shape index: {}]  }
   0x1   :  { %11 = vsyncpa [#allocation8], 0  ;;  %s16_s17 = sshll.u32 %s1681_s1, 4  ;;  %s1290_s18 = smov [#allocation6]   ;;  %s17_s17 = int_to_ptr.hbm [resolvable:$true] %s16_s17 }
   0x2   :  { %s18_s19 = sshll.u32 %s1290_s18, 4  ;;  %s1291_s20 = smov 64   ;;  %s19_s19 = int_to_ptr.vmem [resolvable:$true] %s18_s19 }
   0x3   :  { %s1292_s21 = smov 4  }
   0x4   :  { %24 = dma.hbm_to_vmem [thread:$0]  %s17_s17, 1024, %s19_s19, [#allocation7], %s1291_s20, %s1291_s20, %s1292_s21  }
   0x5   :  { %1286 = dma.done.wait [#allocation7], 1024  }
   0x6   :  { %1287 = vsyncadd [#allocation7], 4294966272  ;;  %vm39_vm0 = vcmask 261120   ;;  %v1293_v0 = vmov 0.0   ;;  %p1014_p0 = scmp.le.s32.totalorder %s1680_s0, 0 }
   0x7   :  { %40 = vst.msk [vmem:[#allocation2] sm:$0xff] %vm39_vm0, %v1293_v0  ;;  %s1294_s27 = smov (!%p1014_p0), 32   ;;  %s1295_s0 = smov (!%p1014_p0), 64  }
   0x8   :  { %41 = vst.msk [vmem:[#allocation2 + $0x8] sm:$0xff] %vm39_vm0, %v1293_v0  ;;  %48 = sbr.rel (%p1014_p0) target bundleno = 4762 (0x129a), region = 25  ;;  %s1297_s29 = smov (!%p1014_p0), 96  }
   0x9   :  { %42 = vst.msk [vmem:[#allocation3] sm:$0xff] %vm39_vm0, %v1293_v0 }
   0xa   :  { %43 = vst.msk [vmem:[#allocation3 + $0x8] sm:$0xff] %vm39_vm0, %v1293_v0 }
   0xd   :  { %v1064_v1 = vld [vmem:[%s1682_s2 + $0x8] sm:$0xff]  ;;  %v1063_v3 = vld [vmem:[%s1682_s2] sm:$0xff]  ;;  %v1296_v24 = vmov 0  }
   0xe   :  { %92 = vmatpush.bf16.msra.mxu0 %v1064_v1  ;;  %v1342_v4 = vld [vmem:[#allocation2] sm:$0xff]  ;;  %217 = vmatpush.bf16.msra.mxu1 %v1064_v1  ;;  %v54_v58 = vld [vmem:[%s1683_s3 + $0x8] sm:$0xff] }
   0xf   :  { %v1344_v5 = vld [vmem:[#allocation2 + $0x8] sm:$0xff]  ;;  %327 = vmatpush.bf16.msra.mxu2 %v1064_v1  ;;  %437 = vmatpush.bf16.msra.mxu3 %v1064_v1  ;;  %v1066_v8 = vld [vmem:[#allocation6] sm:$0xff]  }
  0x10   :  { %v63_v2 = vld [vmem:[#allocation3] sm:$0xff]  ;;  %v69_v6 = vpack.c.bf16 %v1344_v5, %v1342_v4  ;;  %v1067_v9 = vunpack.c.l.bf16 %v1066_v8  ;;  %v1068_v12 = vunpack.c.h.bf16 %v1066_v8  ;;  %1108 = vset.pattern.permute.xlu2 %v1296_v24  ;;  %1109 = vset.pattern.permute.xlu0 %v1296_v24  ;;  %v53_v48 = vld [vmem:[%s1683_s3] sm:$0xff]  ;;  %v1070_v8 = vld [vmem:[#allocation6 + $0x8] sm:$0xff]  }
  0x11   :  { %144 = vrot.lane.b32.xlu1 %v63_v2, %s1294_s27  ;;  %v64_v7 = vld [vmem:[#allocation3 + $0x8] sm:$0xff] }
  0x12   :  { %93 = vmatpush.bf16.msra.mxu0 %v1063_v3  ;;  %218 = vmatpush.bf16.msra.mxu1 %v1063_v3 }
  0x13   :  { %328 = vmatpush.bf16.msra.mxu2 %v1063_v3  ;;  %438 = vmatpush.bf16.msra.mxu3 %v1063_v3 }
  0x15   :  { %1023 = vmatmul.msk.bf16.vlgmr.msra.gmra.mxu0 %vm39_vm0, %v69_v6 }
  0x16   :  { %547 = vmatpush.bf16.msrb.mxu0 %v1064_v1  ;;  %657 = vmatpush.bf16.msrb.mxu1 %v1064_v1 }
  0x17   :  { %767 = vmatpush.bf16.msrb.mxu2 %v1064_v1  ;;  %877 = vmatpush.bf16.msrb.mxu3 %v1064_v1 }
  0x19   :  { %146 = vrot.lane.b32.xlu1 %v64_v7, %s1294_s27 }
  0x1a   :  { %548 = vmatpush.bf16.msrb.mxu0 %v1063_v3  ;;  %658 = vmatpush.bf16.msrb.mxu1 %v1063_v3 }
  0x1b   :  { %768 = vmatpush.bf16.msrb.mxu2 %v1063_v3  ;;  %878 = vmatpush.bf16.msrb.mxu3 %v1063_v3 }
  0x83   :  { %v1360_v49 = vpop.permute.xlu1 %144 }
  0x8b   :  { %v1366_v53 = vpop.permute.xlu1 %146 }
  0x92   :  { %v95_v10 = vpop.f32.mrf.mxu0 }
  0x93   :  { %v100_v11 = vadd.f32 %v1067_v9, %v95_v10  ;;  %v1071_v9 = vunpack.c.l.bf16 %v1070_v8 }
  0x95   :  { %1110 = vtanh.f32 %v100_v11  ;;  %v1024_v17 = vmul.f32 -1.442695, %v100_v11 }
  0x9a   :  { %v97_v13 = vpop.f32.mrf.mxu0 }
  0x9b   :  { %v1111_v14 = vpop.eup %1110  ;;  %v101_v15 = vadd.f32 %v1068_v12, %v97_v13  ;;  %v1072_v12 = vunpack.c.h.bf16 %v1070_v8 }
  0x9c   :  { %154 = vrot.lane.b32.xlu0 %v1111_v14, %s1295_s0 }
  0x9d   :  { %1112 = vtanh.f32 %v101_v15  ;;  %v1025_v18 = vmul.f32 -1.442695, %v101_v15 }
  0x9e   :  { %1114 = vpow2.f32 %v1024_v17 }
  0x9f   :  { %1116 = vpow2.f32 %v1025_v18 }
  0xa3   :  { %v1113_v16 = vpop.eup %1112 }
  0xa4   :  { %156 = vrot.lane.b32.xlu0 %v1113_v16, %s1295_s0  ;;  %v1115_v19 = vpop.eup %1114 }
  0xa5   :  { %v108_v20 = vadd.f32 1.0, %v1115_v19  ;;  %v1117_v21 = vpop.eup %1116 }
  0xa6   :  { %v109_v22 = vadd.f32 1.0, %v1117_v21 }
  0xa7   :  { %1118 = vrcp.f32 %v108_v20  ;;  %v121_v32 = vand.u32 2147483648, %v108_v20  ;;  %vm115_vm2 = vweird.f32 %v108_v20  ;;  %v119_v33 = vand.u32 2147483647, %v108_v20 }
  0xa8   :  { %1120 = vrcp.f32 %v109_v22  ;;  %v136_v41 = vand.u32 2147483648, %v109_v22  ;;  %vm130_vm6 = vweird.f32 %v109_v22  ;;  %v134_v42 = vand.u32 2147483647, %v109_v22 }
  0xa9   :  { %v122_v36 = vor.u32 1.1754944e-38, %v121_v32  ;;  %vm120_vm4 = vcmp.eq.f32.partialorder %v119_v33, 8.507059e+37 }
  0xaa   :  { %v137_v44 = vor.u32 1.1754944e-38, %v136_v41  ;;  %vm135_vm8 = vcmp.eq.f32.partialorder %v134_v42, 8.507059e+37 }
  0xad   :  { %v1119_v23 = vpop.eup %1118 }
  0xae   :  { %v111_v25 = vmul.f32 %v1119_v23, %v108_v20  ;;  %v1121_v27 = vpop.eup %1120  ;;  %vm116_vm1 = vweird.f32 %v1119_v23 }
  0xaf   :  { %v126_v29 = vmul.f32 %v1121_v27, %v109_v22  ;;  %vm117_vm3 = vmor %vm115_vm2, %vm116_vm1  ;;  %vm131_vm5 = vweird.f32 %v1121_v27 }
  0xb0   :  { %v112_v26 = vsub.f32 1.0, %v111_v25  ;;  %vm132_vm7 = vmor %vm130_vm6, %vm131_vm5 }
  0xb1   :  { %v127_v31 = vsub.f32 1.0, %v126_v29 }
  0xb2   :  { %v113_v28 = vmul.f32 %v1119_v23, %v112_v26 }
  0xb3   :  { %v128_v35 = vmul.f32 %v1121_v27, %v127_v31 }
  0xb4   :  { %v114_v30 = vadd.f32 %v1119_v23, %v113_v28 }
  0xb5   :  { %v129_v39 = vadd.f32 %v1121_v27, %v128_v35 }
  0xb6   :  { %v118_v34 = vsel %vm117_vm3, %v1119_v23, %v114_v30 }
  0xb7   :  { %v123_v37 = vsel %vm120_vm4, %v122_v36, %v118_v34  ;;  %v133_v43 = vsel %vm132_vm7, %v1121_v27, %v129_v39 }
  0xb8   :  { %v138_v45 = vsel %vm135_vm8, %v137_v44, %v133_v43  ;;  %v150_v50 = vmul.f32 %v1360_v49, %v123_v37 }
  0xb9   :  { %v151_v54 = vmul.f32 %v1366_v53, %v138_v45 }
 0x10e   :  { %v155_v38 = vpop.permute.xlu0 %154 }
 0x10f   :  { %v160_v40 = vmul.f32 %v155_v38, %v123_v37 }
 0x111   :  { %164 = vrot.lane.b32.xlu2 %v160_v40, %s1294_s27 }
 0x116   :  { %v157_v46 = vpop.permute.xlu0 %156 }
 0x117   :  { %v161_v47 = vmul.f32 %v157_v46, %v138_v45 }
 0x119   :  { %166 = vrot.lane.b32.xlu2 %v161_v47, %s1294_s27 }
 0x121   :  { %56 = vperm.xlu2 %1108, %v53_v48  }
 0x129   :  { %191 = vrot.lane.b32.xlu2 %v1344_v5, %s1297_s29 }
 0x16b   :  { %v165_v51 = vpop.permute.xlu2 %164 }
 0x16c   :  { %v1363_v52 = vadd.f32 %v165_v51, %v150_v50 }
 0x16e   :  { %1122 = vtanh.f32 %v1363_v52 }
 0x173   :  { %v167_v55 = vpop.permute.xlu2 %166 }
 0x174   :  { %v1123_v56 = vpop.eup %1122  ;;  %v1369_v57 = vadd.f32 %v167_v55, %v151_v54 }
 0x175   :  { %176 = vrot.lane.b32.xlu0 %v1123_v56, %s1295_s0 }
 0x176   :  { %1124 = vtanh.f32 %v1369_v57 }
 0x17b   :  { %v1379_v61 = vpop.permute.xlu2 %56 }
 0x17c   :  { %v1125_v59 = vpop.eup %1124  ;;  %vm1026_vm10 = vcmp.gt.s32.totalorder %v1379_v61, 0  ;;  %vm1031_vm4 = vcmp.gt.s32.totalorder %v1379_v61, 1 }
 0x17d   :  { %59 = vperm.xlu0 %1109, %v54_v58   ;;  %178 = vrot.lane.b32.xlu1 %v1125_v59, %s1295_s0  ;;  %v1405_v47 = vsel %vm1026_vm10, %v1363_v52, %v1360_v49 }
 0x183   :  { %v192_v1 = vpop.permute.xlu2 %191 }
 0x185   :  { %189 = vrot.lane.b32.xlu1 %v1342_v4, %s1297_s29 }
 0x1e7   :  { %v177_v60 = vpop.permute.xlu0 %176 }
 0x1e8   :  { %v182_v2 = vmul.f32 %v177_v60, %v123_v37 }
 0x1ef   :  { %v179_v62 = vpop.permute.xlu1 %178  ;;  %v1381_v63 = vpop.permute.xlu0 %59 }
 0x1f0   :  { %v183_v0 = vmul.f32 %v179_v62, %v138_v45  ;;  %vm1027_vm9 = vcmp.gt.s32.totalorder %v1381_v63, 0  ;;  %vm1032_vm5 = vcmp.gt.s32.totalorder %v1381_v63, 1 }
 0x1f1   :  { %v1415_v54 = vsel %vm1027_vm9, %v1369_v57, %v1366_v53 }
 0x1f2   :  { %v1387_v5 = vsel %vm1027_vm9, %v183_v0, %v192_v1 }
 0x1f7   :  { %v190_v3 = vpop.permute.xlu1 %189 }
 0x1f8   :  { %v1391_v4 = vsel %vm1026_vm10, %v182_v2, %v190_v3  ;;  %v1074_v3 = vld [vmem:[#allocation6 + $0x10] sm:$0xff]  }
 0x1f9   :  { %v204_v6 = vpack.c.bf16 %v1387_v5, %v1391_v4 }
 0x1fb   :  { %206 = vrot.lane.b32.xlu1 %v204_v6, %s1294_s27  ;;  %v1075_v6 = vunpack.c.l.bf16 %v1074_v3 }
 0x26d   :  { %v207_v7 = vpop.permute.xlu1 %206 }
 0x26e   :  { %1028 = vmatmul.msk.bf16.vlgmr.msra.gmra.mxu1 %vm39_vm0, %v207_v7 }
 0x2eb   :  { %v220_v10 = vpop.f32.mrf.mxu1 }
 0x2ec   :  { %v225_v11 = vadd.f32 %v1071_v9, %v220_v10 }
 0x2ee   :  { %1126 = vtanh.f32 %v225_v11  ;;  %v1029_v17 = vmul.f32 -1.442695, %v225_v11 }
 0x2f3   :  { %v222_v13 = vpop.f32.mrf.mxu1 }
 0x2f4   :  { %v1127_v14 = vpop.eup %1126  ;;  %v226_v15 = vadd.f32 %v1072_v12, %v222_v13 }
 0x2f5   :  { %271 = vrot.lane.b32.xlu2 %v1127_v14, %s1295_s0 }
 0x2f6   :  { %1128 = vtanh.f32 %v226_v15  ;;  %v1030_v23 = vmul.f32 -1.442695, %v226_v15 }
 0x2f7   :  { %1130 = vpow2.f32 %v1029_v17 }
 0x2fc   :  { %v1129_v16 = vpop.eup %1128 }
 0x2fd   :  { %273 = vrot.lane.b32.xlu0 %v1129_v16, %s1295_s0  ;;  %v1131_v18 = vpop.eup %1130 }
 0x2fe   :  { %v233_v19 = vadd.f32 1.0, %v1131_v18 }
 0x300   :  { %1132 = vrcp.f32 %v233_v19  ;;  %v246_v26 = vand.u32 2147483648, %v233_v19  ;;  %vm240_vm12 = vweird.f32 %v233_v19  ;;  %v244_v27 = vand.u32 2147483647, %v233_v19 }
 0x301   :  { %1134 = vpow2.f32 %v1030_v23 }
 0x302   :  { %v247_v30 = vor.u32 1.1754944e-38, %v246_v26  ;;  %vm245_vm14 = vcmp.eq.f32.partialorder %v244_v27, 8.507059e+37 }
 0x306   :  { %v1133_v20 = vpop.eup %1132 }
 0x307   :  { %v236_v21 = vmul.f32 %v1133_v20, %v233_v19  ;;  %vm241_vm11 = vweird.f32 %v1133_v20  ;;  %v1135_v28 = vpop.eup %1134 }
 0x308   :  { %vm242_vm13 = vmor %vm240_vm12, %vm241_vm11  ;;  %v234_v31 = vadd.f32 1.0, %v1135_v28 }
 0x309   :  { %v237_v22 = vsub.f32 1.0, %v236_v21 }
 0x30a   :  { %1136 = vrcp.f32 %v234_v31  ;;  %v261_v40 = vand.u32 2147483648, %v234_v31  ;;  %vm255_vm1 = vweird.f32 %v234_v31  ;;  %v259_v41 = vand.u32 2147483647, %v234_v31 }
 0x30b   :  { %v238_v24 = vmul.f32 %v1133_v20, %v237_v22 }
 0x30c   :  { %v262_v43 = vor.u32 1.1754944e-38, %v261_v40  ;;  %vm260_vm3 = vcmp.eq.f32.partialorder %v259_v41, 8.507059e+37 }
 0x30d   :  { %v239_v25 = vadd.f32 %v1133_v20, %v238_v24 }
 0x30f   :  { %v243_v29 = vsel %vm242_vm13, %v1133_v20, %v239_v25 }
 0x310   :  { %v248_v33 = vsel %vm245_vm14, %v247_v30, %v243_v29  ;;  %v1137_v35 = vpop.eup %1136  ;;  %vm1036_vm14 = vcmp.gt.s32.totalorder %v1379_v61, 2 }
 0x311   :  { %v251_v36 = vmul.f32 %v1137_v35, %v234_v31  ;;  %vm256_vm15 = vweird.f32 %v1137_v35  ;;  %v267_v48 = vmul.f32 %v248_v33, %v1405_v47 }
 0x312   :  { %vm257_vm2 = vmor %vm255_vm1, %vm256_vm15  ;;  %vm1037_vm15 = vcmp.gt.s32.totalorder %v1381_v63, 2 }
 0x313   :  { %v252_v37 = vsub.f32 1.0, %v251_v36 }
 0x315   :  { %v253_v38 = vmul.f32 %v1137_v35, %v252_v37 }
 0x317   :  { %v254_v39 = vadd.f32 %v1137_v35, %v253_v38 }
 0x319   :  { %v258_v42 = vsel %vm257_vm2, %v1137_v35, %v254_v39 }
 0x31a   :  { %v263_v45 = vsel %vm260_vm3, %v262_v43, %v258_v42 }
 0x31b   :  { %v268_v55 = vmul.f32 %v263_v45, %v1415_v54 }
 0x34f   :  { %v272_v32 = vpop.permute.xlu2 %271 }
 0x350   :  { %v277_v34 = vmul.f32 %v272_v32, %v248_v33 }
 0x352   :  { %281 = vrot.lane.b32.xlu1 %v277_v34, %s1294_s27 }
 0x36f   :  { %v274_v44 = vpop.permute.xlu0 %273 }
 0x370   :  { %v278_v46 = vmul.f32 %v274_v44, %v263_v45 }
 0x372   :  { %283 = vrot.lane.b32.xlu2 %v278_v46, %s1294_s27 }
 0x3c4   :  { %v282_v50 = vpop.permute.xlu1 %281 }
 0x3c5   :  { %v1408_v51 = vadd.f32 %v282_v50, %v267_v48 }
 0x3c7   :  { %1138 = vtanh.f32 %v1408_v51  ;;  %v1447_v42 = vsel %vm1031_vm4, %v1408_v51, %v1405_v47 }
 0x3cc   :  { %v284_v56 = vpop.permute.xlu2 %283 }
 0x3cd   :  { %v1139_v58 = vpop.eup %1138  ;;  %v1418_v59 = vadd.f32 %v284_v56, %v268_v55 }
 0x3ce   :  { %293 = vrot.lane.b32.xlu0 %v1139_v58, %s1295_s0 }
 0x3cf   :  { %1140 = vtanh.f32 %v1418_v59  ;;  %v1458_v48 = vsel %vm1032_vm5, %v1418_v59, %v1415_v54 }
 0x3d5   :  { %v1141_v49 = vpop.eup %1140 }
 0x3d6   :  { %295 = vrot.lane.b32.xlu1 %v1141_v49, %s1295_s0 }
 0x440   :  { %v294_v52 = vpop.permute.xlu0 %293 }
 0x441   :  { %v299_v60 = vmul.f32 %v294_v52, %v248_v33 }
 0x443   :  { %v1428_v53 = vsel %vm1031_vm4, %v299_v60, %v1391_v4  ;;  %v1076_v4 = vunpack.c.h.bf16 %v1074_v3 }
 0x448   :  { %v296_v62 = vpop.permute.xlu1 %295 }
 0x449   :  { %v300_v0 = vmul.f32 %v296_v62, %v263_v45 }
 0x44b   :  { %v1433_v57 = vsel %vm1032_vm5, %v300_v0, %v1387_v5  ;;  %v1078_v0 = vld [vmem:[#allocation6 + $0x18] sm:$0xff]  }
 0x44c   :  { %v314_v1 = vpack.c.bf16 %v1433_v57, %v1428_v53 }
 0x44e   :  { %316 = vrot.lane.b32.xlu2 %v314_v1, %s1294_s27  ;;  %v1079_v1 = vunpack.c.l.bf16 %v1078_v0 }
 0x4a8   :  { %v317_v2 = vpop.permute.xlu2 %316 }
 0x4a9   :  { %1033 = vmatmul.msk.bf16.vlgmr.msra.gmra.mxu2 %vm39_vm0, %v317_v2 }
 0x52c   :  { %v330_v7 = vpop.f32.mrf.mxu2 }
 0x52d   :  { %v335_v8 = vadd.f32 %v1075_v6, %v330_v7 }
 0x52f   :  { %1142 = vtanh.f32 %v335_v8  ;;  %v1034_v12 = vmul.f32 -1.442695, %v335_v8 }
 0x534   :  { %v332_v9 = vpop.f32.mrf.mxu2 }
 0x535   :  { %v1143_v10 = vpop.eup %1142  ;;  %v336_v11 = vadd.f32 %v1076_v4, %v332_v9 }
 0x536   :  { %381 = vrot.lane.b32.xlu0 %v1143_v10, %s1295_s0 }
 0x537   :  { %1144 = vtanh.f32 %v336_v11  ;;  %v1035_v13 = vmul.f32 -1.442695, %v336_v11 }
 0x538   :  { %1146 = vpow2.f32 %v1034_v12 }
 0x539   :  { %1148 = vpow2.f32 %v1035_v13 }
 0x53d   :  { %v1145_v5 = vpop.eup %1144 }
 0x53e   :  { %383 = vrot.lane.b32.xlu1 %v1145_v5, %s1295_s0  ;;  %v1147_v14 = vpop.eup %1146 }
 0x53f   :  { %v343_v15 = vadd.f32 1.0, %v1147_v14  ;;  %v1149_v16 = vpop.eup %1148 }
 0x540   :  { %v344_v17 = vadd.f32 1.0, %v1149_v16 }
 0x541   :  { %1150 = vrcp.f32 %v343_v15  ;;  %v356_v26 = vand.u32 2147483648, %v343_v15  ;;  %vm350_vm7 = vweird.f32 %v343_v15  ;;  %v354_v27 = vand.u32 2147483647, %v343_v15 }
 0x542   :  { %1152 = vrcp.f32 %v344_v17  ;;  %v371_v35 = vand.u32 2147483648, %v344_v17  ;;  %vm365_vm11 = vweird.f32 %v344_v17  ;;  %v369_v36 = vand.u32 2147483647, %v344_v17 }
 0x543   :  { %v357_v30 = vor.u32 1.1754944e-38, %v356_v26  ;;  %vm355_vm9 = vcmp.eq.f32.partialorder %v354_v27, 8.507059e+37 }
 0x544   :  { %v372_v38 = vor.u32 1.1754944e-38, %v371_v35  ;;  %vm370_vm13 = vcmp.eq.f32.partialorder %v369_v36, 8.507059e+37 }
 0x547   :  { %v1151_v18 = vpop.eup %1150 }
 0x548   :  { %v346_v19 = vmul.f32 %v1151_v18, %v343_v15  ;;  %v1153_v21 = vpop.eup %1152  ;;  %vm351_vm6 = vweird.f32 %v1151_v18 }
 0x549   :  { %v361_v23 = vmul.f32 %v1153_v21, %v344_v17  ;;  %vm352_vm8 = vmor %vm350_vm7, %vm351_vm6  ;;  %vm366_vm10 = vweird.f32 %v1153_v21 }
 0x54a   :  { %v347_v20 = vsub.f32 1.0, %v346_v19  ;;  %vm367_vm12 = vmor %vm365_vm11, %vm366_vm10  ;;  %vm1042_vm10 = vcmp.gt.s32.totalorder %v1381_v63, 3 }
 0x54b   :  { %v362_v25 = vsub.f32 1.0, %v361_v23 }
 0x54c   :  { %v348_v22 = vmul.f32 %v1151_v18, %v347_v20 }
 0x54d   :  { %v363_v29 = vmul.f32 %v1153_v21, %v362_v25 }
 0x54e   :  { %v349_v24 = vadd.f32 %v1151_v18, %v348_v22 }
 0x54f   :  { %v364_v34 = vadd.f32 %v1153_v21, %v363_v29 }
 0x550   :  { %v353_v28 = vsel %vm352_vm8, %v1151_v18, %v349_v24 }
 0x551   :  { %v358_v32 = vsel %vm355_vm9, %v357_v30, %v353_v28  ;;  %v368_v37 = vsel %vm367_vm12, %v1153_v21, %v364_v34  ;;  %vm1041_vm9 = vcmp.gt.s32.totalorder %v1379_v61, 3 }
 0x552   :  { %v373_v40 = vsel %vm370_vm13, %v372_v38, %v368_v37  ;;  %v377_v43 = vmul.f32 %v358_v32, %v1447_v42 }
 0x553   :  { %v378_v50 = vmul.f32 %v373_v40, %v1458_v48 }
 0x5a8   :  { %v382_v31 = vpop.permute.xlu0 %381 }
 0x5a9   :  { %v387_v33 = vmul.f32 %v382_v31, %v358_v32 }
 0x5ab   :  { %391 = vrot.lane.b32.xlu2 %v387_v33, %s1294_s27 }
 0x5b0   :  { %v384_v39 = vpop.permute.xlu1 %383 }
 0x5b1   :  { %v388_v41 = vmul.f32 %v384_v39, %v373_v40 }
 0x5b3   :  { %393 = vrot.lane.b32.xlu0 %v388_v41, %s1294_s27 }
 0x605   :  { %v392_v44 = vpop.permute.xlu2 %391 }
 0x606   :  { %v1450_v45 = vadd.f32 %v392_v44, %v377_v43 }
 0x608   :  { %1154 = vtanh.f32 %v1450_v45  ;;  %v1500_v43 = vsel %vm1036_vm14, %v1450_v45, %v1447_v42 }
 0x60e   :  { %v1155_v46 = vpop.eup %1154 }
 0x60f   :  { %403 = vrot.lane.b32.xlu1 %v1155_v46, %s1295_s0 }
 0x625   :  { %v394_v47 = vpop.permute.xlu0 %393 }
 0x626   :  { %v1461_v51 = vadd.f32 %v394_v47, %v378_v50 }
 0x628   :  { %1156 = vtanh.f32 %v1461_v51  ;;  %v1489_v37 = vsel %vm1037_vm15, %v1461_v51, %v1458_v48 }
 0x62e   :  { %v1157_v55 = vpop.eup %1156 }
 0x62f   :  { %405 = vrot.lane.b32.xlu2 %v1157_v55, %s1295_s0 }
 0x681   :  { %v404_v56 = vpop.permute.xlu1 %403 }
 0x682   :  { %v409_v58 = vmul.f32 %v404_v56, %v358_v32 }
 0x684   :  { %v1470_v54 = vsel %vm1036_vm14, %v409_v58, %v1428_v53  ;;  %v1080_v53 = vunpack.c.h.bf16 %v1078_v0 }
 0x689   :  { %v406_v49 = vpop.permute.xlu2 %405 }
 0x68a   :  { %v410_v52 = vmul.f32 %v406_v49, %v373_v40 }
 0x68c   :  { %v1475_v59 = vsel %vm1037_vm15, %v410_v52, %v1433_v57  ;;  %v1082_v52 = vld [vmem:[#allocation6 + $0x20] sm:$0xff]  }
 0x68d   :  { %v424_v60 = vpack.c.bf16 %v1475_v59, %v1470_v54 }
 0x68f   :  { %426 = vrot.lane.b32.xlu0 %v424_v60, %s1294_s27  ;;  %v1083_v60 = vunpack.c.l.bf16 %v1082_v52 }
 0x701   :  { %v427_v62 = vpop.permute.xlu0 %426 }
 0x702   :  { %1038 = vmatmul.msk.bf16.vlgmr.msra.gmra.mxu3 %vm39_vm0, %v427_v62 }
 0x785   :  { %v440_v2 = vpop.f32.mrf.mxu3 }
 0x786   :  { %v445_v3 = vadd.f32 %v1079_v1, %v440_v2 }
 0x788   :  { %1158 = vtanh.f32 %v445_v3  ;;  %v1039_v11 = vmul.f32 -1.442695, %v445_v3 }
 0x78d   :  { %v442_v6 = vpop.f32.mrf.mxu3 }
 0x78e   :  { %v1159_v7 = vpop.eup %1158  ;;  %v446_v8 = vadd.f32 %v1080_v53, %v442_v6 }
 0x78f   :  { %491 = vrot.lane.b32.xlu1 %v1159_v7, %s1295_s0 }
 0x790   :  { %1160 = vtanh.f32 %v446_v8  ;;  %v1040_v4 = vmul.f32 -1.442695, %v446_v8 }
 0x792   :  { %1162 = vpow2.f32 %v1040_v4 }
 0x796   :  { %v1161_v57 = vpop.eup %1160 }
 0x797   :  { %493 = vrot.lane.b32.xlu2 %v1161_v57, %s1295_s0 }
 0x798   :  { %v1163_v9 = vpop.eup %1162 }
 0x799   :  { %v454_v10 = vadd.f32 1.0, %v1163_v9 }
 0x79b   :  { %1164 = vrcp.f32 %v454_v10  ;;  %v481_v19 = vand.u32 2147483648, %v454_v10  ;;  %vm475_vm2 = vweird.f32 %v454_v10  ;;  %v479_v20 = vand.u32 2147483647, %v454_v10 }
 0x79c   :  { %1166 = vpow2.f32 %v1039_v11 }
 0x79d   :  { %v482_v23 = vor.u32 1.1754944e-38, %v481_v19  ;;  %vm480_vm4 = vcmp.eq.f32.partialorder %v479_v20, 8.507059e+37 }
 0x7a1   :  { %v1165_v5 = vpop.eup %1164 }
 0x7a2   :  { %v1167_v12 = vpop.eup %1166  ;;  %v471_v13 = vmul.f32 %v1165_v5, %v454_v10  ;;  %vm476_vm1 = vweird.f32 %v1165_v5 }
 0x7a3   :  { %v453_v14 = vadd.f32 1.0, %v1167_v12  ;;  %vm477_vm3 = vmor %vm475_vm2, %vm476_vm1 }
 0x7a4   :  { %v472_v15 = vsub.f32 1.0, %v471_v13 }
 0x7a5   :  { %1168 = vrcp.f32 %v453_v14  ;;  %v466_v30 = vand.u32 2147483648, %v453_v14  ;;  %vm460_vm6 = vweird.f32 %v453_v14  ;;  %v464_v31 = vand.u32 2147483647, %v453_v14 }
 0x7a6   :  { %v473_v16 = vmul.f32 %v1165_v5, %v472_v15 }
 0x7a7   :  { %v467_v33 = vor.u32 1.1754944e-38, %v466_v30  ;;  %vm465_vm8 = vcmp.eq.f32.partialorder %v464_v31, 8.507059e+37 }
 0x7a8   :  { %v474_v17 = vadd.f32 %v1165_v5, %v473_v16 }
 0x7aa   :  { %v478_v21 = vsel %vm477_vm3, %v1165_v5, %v474_v17 }
 0x7ab   :  { %v1169_v18 = vpop.eup %1168  ;;  %v483_v25 = vsel %vm480_vm4, %v482_v23, %v478_v21  ;;  %vm1046_vm4 = vcmp.gt.s32.totalorder %v1379_v61, 4 }
 0x7ac   :  { %v456_v22 = vmul.f32 %v1169_v18, %v453_v14  ;;  %vm461_vm5 = vweird.f32 %v1169_v18  ;;  %v488_v38 = vmul.f32 %v483_v25, %v1489_v37 }
 0x7ad   :  { %vm462_vm7 = vmor %vm460_vm6, %vm461_vm5  ;;  %vm1047_vm5 = vcmp.gt.s32.totalorder %v1381_v63, 4 }
 0x7ae   :  { %v457_v27 = vsub.f32 1.0, %v456_v22 }
 0x7b0   :  { %v458_v28 = vmul.f32 %v1169_v18, %v457_v27 }
 0x7b2   :  { %v459_v29 = vadd.f32 %v1169_v18, %v458_v28 }
 0x7b4   :  { %v463_v32 = vsel %vm462_vm7, %v1169_v18, %v459_v29 }
 0x7b5   :  { %v468_v35 = vsel %vm465_vm8, %v467_v33, %v463_v32 }
 0x7b6   :  { %v487_v44 = vmul.f32 %v468_v35, %v1500_v43 }
 0x7f1   :  { %v494_v24 = vpop.permute.xlu2 %493 }
 0x7f2   :  { %v498_v26 = vmul.f32 %v494_v24, %v483_v25 }
 0x7f4   :  { %503 = vrot.lane.b32.xlu1 %v498_v26, %s1294_s27 }
 0x801   :  { %v492_v34 = vpop.permute.xlu1 %491 }
 0x802   :  { %v497_v36 = vmul.f32 %v492_v34, %v468_v35 }
 0x804   :  { %501 = vrot.lane.b32.xlu0 %v497_v36, %s1294_s27 }
 0x866   :  { %v504_v39 = vpop.permute.xlu1 %503 }
 0x867   :  { %v1492_v40 = vadd.f32 %v504_v39, %v488_v38 }
 0x869   :  { %1170 = vtanh.f32 %v1492_v40  ;;  %v1541_v36 = vsel %vm1042_vm10, %v1492_v40, %v1489_v37 }
 0x86f   :  { %v1171_v41 = vpop.eup %1170 }
 0x870   :  { %515 = vrot.lane.b32.xlu0 %v1171_v41, %s1295_s0 }
 0x876   :  { %v502_v46 = vpop.permute.xlu0 %501 }
 0x877   :  { %v1503_v48 = vadd.f32 %v502_v46, %v487_v44 }
 0x879   :  { %1172 = vtanh.f32 %v1503_v48  ;;  %v1531_v32 = vsel %vm1041_vm9, %v1503_v48, %v1500_v43 }
 0x87f   :  { %v1173_v50 = vpop.eup %1172 }
 0x880   :  { %513 = vrot.lane.b32.xlu2 %v1173_v50, %s1295_s0 }
 0x8da   :  { %v514_v47 = vpop.permute.xlu2 %513 }
 0x8db   :  { %v519_v51 = vmul.f32 %v514_v47, %v468_v35 }
 0x8dd   :  { %v1512_v42 = vsel %vm1041_vm9, %v519_v51, %v1470_v54  ;;  %v1084_v54 = vunpack.c.h.bf16 %v1082_v52 }
 0x8e2   :  { %v516_v55 = vpop.permute.xlu0 %515 }
 0x8e3   :  { %v520_v56 = vmul.f32 %v516_v55, %v483_v25 }
 0x8e5   :  { %v1517_v45 = vsel %vm1042_vm10, %v520_v56, %v1475_v59  ;;  %v1086_v56 = vld [vmem:[#allocation6 + $0x28] sm:$0xff]  }
 0x8e6   :  { %v534_v58 = vpack.c.bf16 %v1517_v45, %v1512_v42 }
 0x8e8   :  { %536 = vrot.lane.b32.xlu1 %v534_v58, %s1294_s27  ;;  %v1087_v58 = vunpack.c.l.bf16 %v1086_v56 }
 0x95a   :  { %v537_v49 = vpop.permute.xlu1 %536 }
 0x95b   :  { %1043 = vmatmul.msk.bf16.vlgmr.msrb.gmra.mxu0 %vm39_vm0, %v537_v49 }
 0x9d8   :  { %v550_v62 = vpop.f32.mrf.mxu0 }
 0x9d9   :  { %v555_v0 = vadd.f32 %v1083_v60, %v550_v62 }
 0x9db   :  { %1174 = vtanh.f32 %v555_v0  ;;  %v1044_v53 = vmul.f32 -1.442695, %v555_v0 }
 0x9e0   :  { %v552_v1 = vpop.f32.mrf.mxu0 }
 0x9e1   :  { %v1175_v2 = vpop.eup %1174  ;;  %v556_v3 = vadd.f32 %v1084_v54, %v552_v1 }
 0x9e2   :  { %601 = vrot.lane.b32.xlu2 %v1175_v2, %s1295_s0 }
 0x9e3   :  { %1176 = vtanh.f32 %v556_v3  ;;  %v1045_v9 = vmul.f32 -1.442695, %v556_v3 }
 0x9e4   :  { %1178 = vpow2.f32 %v1044_v53 }
 0x9e9   :  { %v1177_v59 = vpop.eup %1176 }
 0x9ea   :  { %603 = vrot.lane.b32.xlu0 %v1177_v59, %s1295_s0  ;;  %v1179_v6 = vpop.eup %1178 }
 0x9eb   :  { %v563_v7 = vadd.f32 1.0, %v1179_v6 }
 0x9ed   :  { %1180 = vrcp.f32 %v563_v7  ;;  %v576_v5 = vand.u32 2147483648, %v563_v7  ;;  %vm570_vm12 = vweird.f32 %v563_v7  ;;  %v574_v12 = vand.u32 2147483647, %v563_v7 }
 0x9ee   :  { %1182 = vpow2.f32 %v1045_v9 }
 0x9ef   :  { %v577_v15 = vor.u32 1.1754944e-38, %v576_v5  ;;  %vm575_vm14 = vcmp.eq.f32.partialorder %v574_v12, 8.507059e+37 }
 0x9f3   :  { %v1181_v8 = vpop.eup %1180 }
 0x9f4   :  { %v566_v57 = vmul.f32 %v1181_v8, %v563_v7  ;;  %vm571_vm11 = vweird.f32 %v1181_v8  ;;  %v1183_v13 = vpop.eup %1182 }
 0x9f5   :  { %vm572_vm13 = vmor %vm570_vm12, %vm571_vm11  ;;  %v564_v16 = vadd.f32 1.0, %v1183_v13 }
 0x9f6   :  { %v567_v4 = vsub.f32 1.0, %v566_v57 }
 0x9f7   :  { %1184 = vrcp.f32 %v564_v16  ;;  %v591_v25 = vand.u32 2147483648, %v564_v16  ;;  %vm585_vm1 = vweird.f32 %v564_v16  ;;  %v589_v26 = vand.u32 2147483647, %v564_v16 }
 0x9f8   :  { %v568_v10 = vmul.f32 %v1181_v8, %v567_v4 }
 0x9f9   :  { %v592_v28 = vor.u32 1.1754944e-38, %v591_v25  ;;  %vm590_vm3 = vcmp.eq.f32.partialorder %v589_v26, 8.507059e+37 }
 0x9fa   :  { %v569_v11 = vadd.f32 %v1181_v8, %v568_v10 }
 0x9fc   :  { %v573_v14 = vsel %vm572_vm13, %v1181_v8, %v569_v11 }
 0x9fd   :  { %v578_v18 = vsel %vm575_vm14, %v577_v15, %v573_v14  ;;  %v1185_v20 = vpop.eup %1184  ;;  %vm1051_vm14 = vcmp.gt.s32.totalorder %v1379_v61, 5 }
 0x9fe   :  { %v581_v21 = vmul.f32 %v1185_v20, %v564_v16  ;;  %vm586_vm15 = vweird.f32 %v1185_v20  ;;  %v597_v33 = vmul.f32 %v578_v18, %v1531_v32 }
 0x9ff   :  { %vm587_vm2 = vmor %vm585_vm1, %vm586_vm15  ;;  %vm1052_vm15 = vcmp.gt.s32.totalorder %v1381_v63, 5 }
 0xa00   :  { %v582_v22 = vsub.f32 1.0, %v581_v21 }
 0xa02   :  { %v583_v23 = vmul.f32 %v1185_v20, %v582_v22 }
 0xa04   :  { %v584_v24 = vadd.f32 %v1185_v20, %v583_v23 }
 0xa06   :  { %v588_v27 = vsel %vm587_vm2, %v1185_v20, %v584_v24 }
 0xa07   :  { %v593_v30 = vsel %vm590_vm3, %v592_v28, %v588_v27 }
 0xa08   :  { %v598_v38 = vmul.f32 %v593_v30, %v1541_v36 }
 0xa3c   :  { %v602_v17 = vpop.permute.xlu2 %601 }
 0xa3d   :  { %v607_v19 = vmul.f32 %v602_v17, %v578_v18 }
 0xa3f   :  { %611 = vrot.lane.b32.xlu1 %v607_v19, %s1294_s27 }
 0xa5c   :  { %v604_v29 = vpop.permute.xlu0 %603 }
 0xa5d   :  { %v608_v31 = vmul.f32 %v604_v29, %v593_v30 }
 0xa5f   :  { %613 = vrot.lane.b32.xlu2 %v608_v31, %s1294_s27 }
 0xab1   :  { %v612_v34 = vpop.permute.xlu1 %611 }
 0xab2   :  { %v1534_v35 = vadd.f32 %v612_v34, %v597_v33 }
 0xab4   :  { %1186 = vtanh.f32 %v1534_v35  ;;  %v1573_v27 = vsel %vm1046_vm4, %v1534_v35, %v1531_v32 }
 0xab9   :  { %v614_v39 = vpop.permute.xlu2 %613 }
 0xaba   :  { %v1187_v41 = vpop.eup %1186  ;;  %v1544_v44 = vadd.f32 %v614_v39, %v598_v38 }
 0xabb   :  { %623 = vrot.lane.b32.xlu0 %v1187_v41, %s1295_s0 }
 0xabc   :  { %1188 = vtanh.f32 %v1544_v44  ;;  %v1584_v33 = vsel %vm1047_vm5, %v1544_v44, %v1541_v36 }
 0xac2   :  { %v1189_v43 = vpop.eup %1188 }
 0xac3   :  { %625 = vrot.lane.b32.xlu1 %v1189_v43, %s1295_s0 }
 0xb2d   :  { %v624_v46 = vpop.permute.xlu0 %623 }
 0xb2e   :  { %v629_v48 = vmul.f32 %v624_v46, %v578_v18 }
 0xb30   :  { %v1554_v37 = vsel %vm1046_vm4, %v629_v48, %v1512_v42  ;;  %v1088_v42 = vunpack.c.h.bf16 %v1086_v56 }
 0xb35   :  { %v626_v50 = vpop.permute.xlu1 %625 }
 0xb36   :  { %v630_v47 = vmul.f32 %v626_v50, %v593_v30 }
 0xb38   :  { %v1559_v40 = vsel %vm1047_vm5, %v630_v47, %v1517_v45  ;;  %v1090_v47 = vld [vmem:[#allocation6 + $0x30] sm:$0xff]  }
 0xb39   :  { %v644_v51 = vpack.c.bf16 %v1559_v40, %v1554_v37 }
 0xb3b   :  { %646 = vrot.lane.b32.xlu2 %v644_v51, %s1294_s27  ;;  %v1091_v51 = vunpack.c.l.bf16 %v1090_v47 }
 0xb95   :  { %v647_v55 = vpop.permute.xlu2 %646 }
 0xb96   :  { %1048 = vmatmul.msk.bf16.vlgmr.msrb.gmra.mxu1 %vm39_vm0, %v647_v55 }
 0xc13   :  { %v660_v49 = vpop.f32.mrf.mxu1 }
 0xc14   :  { %v665_v52 = vadd.f32 %v1087_v58, %v660_v49 }
 0xc16   :  { %1190 = vtanh.f32 %v665_v52  ;;  %v1049_v54 = vmul.f32 -1.442695, %v665_v52 }
 0xc1b   :  { %v662_v60 = vpop.f32.mrf.mxu1 }
 0xc1c   :  { %v1191_v62 = vpop.eup %1190  ;;  %v666_v0 = vadd.f32 %v1088_v42, %v662_v60 }
 0xc1d   :  { %711 = vrot.lane.b32.xlu0 %v1191_v62, %s1295_s0 }
 0xc1e   :  { %1192 = vtanh.f32 %v666_v0  ;;  %v1050_v1 = vmul.f32 -1.442695, %v666_v0 }
 0xc1f   :  { %1194 = vpow2.f32 %v1049_v54 }
 0xc20   :  { %1196 = vpow2.f32 %v1050_v1 }
 0xc24   :  { %v1193_v45 = vpop.eup %1192 }
 0xc25   :  { %713 = vrot.lane.b32.xlu1 %v1193_v45, %s1295_s0  ;;  %v1195_v2 = vpop.eup %1194 }
 0xc26   :  { %v673_v3 = vadd.f32 1.0, %v1195_v2  ;;  %v1197_v59 = vpop.eup %1196 }
 0xc27   :  { %v674_v53 = vadd.f32 1.0, %v1197_v59 }
 0xc28   :  { %1198 = vrcp.f32 %v673_v3  ;;  %v686_v5 = vand.u32 2147483648, %v673_v3  ;;  %vm680_vm7 = vweird.f32 %v673_v3  ;;  %v684_v12 = vand.u32 2147483647, %v673_v3 }
 0xc29   :  { %1200 = vrcp.f32 %v674_v53  ;;  %v701_v20 = vand.u32 2147483648, %v674_v53  ;;  %vm695_vm11 = vweird.f32 %v674_v53  ;;  %v699_v21 = vand.u32 2147483647, %v674_v53 }
 0xc2a   :  { %v687_v15 = vor.u32 1.1754944e-38, %v686_v5  ;;  %vm685_vm9 = vcmp.eq.f32.partialorder %v684_v12, 8.507059e+37 }
 0xc2b   :  { %v702_v23 = vor.u32 1.1754944e-38, %v701_v20  ;;  %vm700_vm13 = vcmp.eq.f32.partialorder %v699_v21, 8.507059e+37 }
 0xc2e   :  { %v1199_v6 = vpop.eup %1198 }
 0xc2f   :  { %v676_v7 = vmul.f32 %v1199_v6, %v673_v3  ;;  %v1201_v57 = vpop.eup %1200  ;;  %vm681_vm6 = vweird.f32 %v1199_v6 }
 0xc30   :  { %v691_v9 = vmul.f32 %v1201_v57, %v674_v53  ;;  %vm682_vm8 = vmor %vm680_vm7, %vm681_vm6  ;;  %vm696_vm10 = vweird.f32 %v1201_v57 }
 0xc31   :  { %v677_v8 = vsub.f32 1.0, %v676_v7  ;;  %vm697_vm12 = vmor %vm695_vm11, %vm696_vm10  ;;  %vm1057_vm10 = vcmp.gt.s32.totalorder %v1381_v63, 6 }
 0xc32   :  { %v692_v11 = vsub.f32 1.0, %v691_v9 }
 0xc33   :  { %v678_v4 = vmul.f32 %v1199_v6, %v677_v8 }
 0xc34   :  { %v693_v14 = vmul.f32 %v1201_v57, %v692_v11 }
 0xc35   :  { %v679_v10 = vadd.f32 %v1199_v6, %v678_v4 }
 0xc36   :  { %v694_v19 = vadd.f32 %v1201_v57, %v693_v14 }
 0xc37   :  { %v683_v13 = vsel %vm682_vm8, %v1199_v6, %v679_v10 }
 0xc38   :  { %v688_v17 = vsel %vm685_vm9, %v687_v15, %v683_v13  ;;  %v698_v22 = vsel %vm697_vm12, %v1201_v57, %v694_v19  ;;  %vm1056_vm9 = vcmp.gt.s32.totalorder %v1379_v61, 6 }
 0xc39   :  { %v703_v25 = vsel %vm700_vm13, %v702_v23, %v698_v22  ;;  %v707_v28 = vmul.f32 %v688_v17, %v1573_v27 }
 0xc3a   :  { %v708_v34 = vmul.f32 %v703_v25, %v1584_v33 }
 0xc8f   :  { %v712_v16 = vpop.permute.xlu0 %711 }
 0xc90   :  { %v717_v18 = vmul.f32 %v712_v16, %v688_v17 }
 0xc92   :  { %721 = vrot.lane.b32.xlu2 %v717_v18, %s1294_s27 }
 0xc97   :  { %v714_v24 = vpop.permute.xlu1 %713 }
 0xc98   :  { %v718_v26 = vmul.f32 %v714_v24, %v703_v25 }
 0xc9a   :  { %723 = vrot.lane.b32.xlu0 %v718_v26, %s1294_s27 }
 0xcec   :  { %v722_v29 = vpop.permute.xlu2 %721 }
 0xced   :  { %v1576_v30 = vadd.f32 %v722_v29, %v707_v28 }
 0xcef   :  { %1202 = vtanh.f32 %v1576_v30  ;;  %v1626_v28 = vsel %vm1051_vm14, %v1576_v30, %v1573_v27 }
 0xcf5   :  { %v1203_v31 = vpop.eup %1202 }
 0xcf6   :  { %733 = vrot.lane.b32.xlu1 %v1203_v31, %s1295_s0 }
 0xd0c   :  { %v724_v32 = vpop.permute.xlu0 %723 }
 0xd0d   :  { %v1587_v35 = vadd.f32 %v724_v32, %v708_v34 }
 0xd0f   :  { %1204 = vtanh.f32 %v1587_v35  ;;  %v1615_v22 = vsel %vm1052_vm15, %v1587_v35, %v1584_v33 }
 0xd15   :  { %v1205_v38 = vpop.eup %1204 }
 0xd16   :  { %735 = vrot.lane.b32.xlu2 %v1205_v38, %s1295_s0 }
 0xd68   :  { %v734_v39 = vpop.permute.xlu1 %733 }
 0xd69   :  { %v739_v41 = vmul.f32 %v734_v39, %v688_v17 }
 0xd6b   :  { %v1596_v36 = vsel %vm1051_vm14, %v739_v41, %v1554_v37  ;;  %v1092_v37 = vunpack.c.h.bf16 %v1090_v47 }
 0xd70   :  { %v736_v43 = vpop.permute.xlu2 %735 }
 0xd71   :  { %v740_v46 = vmul.f32 %v736_v43, %v703_v25 }
 0xd73   :  { %v1601_v44 = vsel %vm1052_vm15, %v740_v46, %v1559_v40  ;;  %v1094_v46 = vld [vmem:[#allocation6 + $0x38] sm:$0xff]  }
 0xd74   :  { %v754_v48 = vpack.c.bf16 %v1601_v44, %v1596_v36 }
 0xd76   :  { %756 = vrot.lane.b32.xlu0 %v754_v48, %s1294_s27  ;;  %v1095_v48 = vunpack.c.l.bf16 %v1094_v46 }
 0xde8   :  { %v757_v50 = vpop.permute.xlu0 %756 }
 0xde9   :  { %1053 = vmatmul.msk.bf16.vlgmr.msrb.gmra.mxu2 %vm39_vm0, %v757_v50 }
 0xe6c   :  { %v770_v55 = vpop.f32.mrf.mxu2 }
 0xe6d   :  { %v775_v56 = vadd.f32 %v1091_v51, %v770_v55 }
 0xe6f   :  { %1206 = vtanh.f32 %v775_v56  ;;  %v1054_v0 = vmul.f32 -1.442695, %v775_v56 }
 0xe74   :  { %v772_v58 = vpop.f32.mrf.mxu2 }
 0xe75   :  { %v1207_v49 = vpop.eup %1206  ;;  %v776_v52 = vadd.f32 %v1092_v37, %v772_v58 }
 0xe76   :  { %821 = vrot.lane.b32.xlu1 %v1207_v49, %s1295_s0 }
 0xe77   :  { %1208 = vtanh.f32 %v776_v52  ;;  %v1055_v42 = vmul.f32 -1.442695, %v776_v52 }
 0xe79   :  { %1210 = vpow2.f32 %v1055_v42 }
 0xe7d   :  { %v1209_v40 = vpop.eup %1208 }
 0xe7e   :  { %823 = vrot.lane.b32.xlu2 %v1209_v40, %s1295_s0 }
 0xe7f   :  { %v1211_v60 = vpop.eup %1210 }
 0xe80   :  { %v784_v62 = vadd.f32 1.0, %v1211_v60 }
 0xe82   :  { %1212 = vrcp.f32 %v784_v62  ;;  %v811_v7 = vand.u32 2147483648, %v784_v62  ;;  %vm805_vm2 = vweird.f32 %v784_v62  ;;  %v809_v8 = vand.u32 2147483647, %v784_v62 }
 0xe83   :  { %1214 = vpow2.f32 %v1054_v0 }
 0xe84   :  { %v812_v9 = vor.u32 1.1754944e-38, %v811_v7  ;;  %vm810_vm4 = vcmp.eq.f32.partialorder %v809_v8, 8.507059e+37 }
 0xe88   :  { %v1213_v45 = vpop.eup %1212 }
 0xe89   :  { %v1215_v54 = vpop.eup %1214  ;;  %v801_v1 = vmul.f32 %v1213_v45, %v784_v62  ;;  %vm806_vm1 = vweird.f32 %v1213_v45 }
 0xe8a   :  { %v783_v2 = vadd.f32 1.0, %v1215_v54  ;;  %vm807_vm3 = vmor %vm805_vm2, %vm806_vm1 }
 0xe8b   :  { %v802_v3 = vsub.f32 1.0, %v801_v1 }
 0xe8c   :  { %1216 = vrcp.f32 %v783_v2  ;;  %v796_v15 = vand.u32 2147483648, %v783_v2  ;;  %vm790_vm6 = vweird.f32 %v783_v2  ;;  %v794_v16 = vand.u32 2147483647, %v783_v2 }
 0xe8d   :  { %v803_v59 = vmul.f32 %v1213_v45, %v802_v3 }
 0xe8e   :  { %v797_v18 = vor.u32 1.1754944e-38, %v796_v15  ;;  %vm795_vm8 = vcmp.eq.f32.partialorder %v794_v16, 8.507059e+37 }
 0xe8f   :  { %v804_v53 = vadd.f32 %v1213_v45, %v803_v59 }
 0xe91   :  { %v808_v57 = vsel %vm807_vm3, %v1213_v45, %v804_v53 }
 0xe92   :  { %v1217_v6 = vpop.eup %1216  ;;  %v813_v11 = vsel %vm810_vm4, %v812_v9, %v808_v57  ;;  %vm1061_vm4 = vcmp.gt.s32.totalorder %v1379_v61, 7 }
 0xe93   :  { %v786_v4 = vmul.f32 %v1217_v6, %v783_v2  ;;  %vm791_vm5 = vweird.f32 %v1217_v6  ;;  %v818_v23 = vmul.f32 %v813_v11, %v1615_v22 }
 0xe94   :  { %vm792_vm7 = vmor %vm790_vm6, %vm791_vm5  ;;  %vm1062_vm5 = vcmp.gt.s32.totalorder %v1381_v63, 7 }
 0xe95   :  { %v787_v12 = vsub.f32 1.0, %v786_v4 }
 0xe97   :  { %v788_v13 = vmul.f32 %v1217_v6, %v787_v12 }
 0xe99   :  { %v789_v14 = vadd.f32 %v1217_v6, %v788_v13 }
 0xe9b   :  { %v793_v17 = vsel %vm792_vm7, %v1217_v6, %v789_v14 }
 0xe9c   :  { %v798_v20 = vsel %vm795_vm8, %v797_v18, %v793_v17 }
 0xe9d   :  { %v817_v29 = vmul.f32 %v798_v20, %v1626_v28 }
 0xed8   :  { %v824_v10 = vpop.permute.xlu2 %823 }
 0xed9   :  { %v828_v5 = vmul.f32 %v824_v10, %v813_v11 }
 0xedb   :  { %833 = vrot.lane.b32.xlu1 %v828_v5, %s1294_s27 }
 0xee8   :  { %v822_v19 = vpop.permute.xlu1 %821 }
 0xee9   :  { %v827_v21 = vmul.f32 %v822_v19, %v798_v20 }
 0xeeb   :  { %831 = vrot.lane.b32.xlu0 %v827_v21, %s1294_s27 }
 0xf4d   :  { %v834_v24 = vpop.permute.xlu1 %833 }
 0xf4e   :  { %v1618_v25 = vadd.f32 %v834_v24, %v818_v23 }
 0xf50   :  { %1218 = vtanh.f32 %v1618_v25  ;;  %v858_v21 = vsel %vm1057_vm10, %v1618_v25, %v1615_v22 }
 0xf56   :  { %v1219_v26 = vpop.eup %1218 }
 0xf57   :  { %845 = vrot.lane.b32.xlu0 %v1219_v26, %s1295_s0 }
 0xf5d   :  { %v832_v31 = vpop.permute.xlu0 %831 }
 0xf5e   :  { %v1629_v33 = vadd.f32 %v832_v31, %v817_v29 }
 0xf60   :  { %1220 = vtanh.f32 %v1629_v33  ;;  %v857_v17 = vsel %vm1056_vm9, %v1629_v33, %v1626_v28 }
 0xf66   :  { %v1221_v34 = vpop.eup %1220 }
 0xf67   :  { %843 = vrot.lane.b32.xlu2 %v1221_v34, %s1295_s0 }
 0xfc1   :  { %v844_v32 = vpop.permute.xlu2 %843 }
 0xfc2   :  { %v849_v35 = vmul.f32 %v844_v32, %v798_v20 }
 0xfc4   :  { %v1638_v27 = vsel %vm1056_vm9, %v849_v35, %v1596_v36  ;;  %v1096_v36 = vunpack.c.h.bf16 %v1094_v46 }
 0xfc9   :  { %v846_v38 = vpop.permute.xlu0 %845 }
 0xfca   :  { %v850_v39 = vmul.f32 %v846_v38, %v813_v11 }
 0xfcc   :  { %v1643_v30 = vsel %vm1057_vm10, %v850_v39, %v1601_v44 }
 0xfcd   :  { %v864_v41 = vpack.c.bf16 %v1643_v30, %v1638_v27 }
 0xfcf   :  { %866 = vrot.lane.b32.xlu1 %v864_v41, %s1294_s27 }
0x1041   :  { %v867_v43 = vpop.permute.xlu1 %866 }
0x1042   :  { %1058 = vmatmul.msk.bf16.vlgmr.msrb.gmra.mxu3 %vm39_vm0, %v867_v43 }
0x10c5   :  { %v880_v50 = vpop.f32.mrf.mxu3 }
0x10c6   :  { %v885_v47 = vadd.f32 %v1095_v48, %v880_v50 }
0x10c8   :  { %1222 = vtanh.f32 %v885_v47  ;;  %v1059_v37 = vmul.f32 -1.442695, %v885_v47 }
0x10cd   :  { %v882_v51 = vpop.f32.mrf.mxu3 }
0x10ce   :  { %v1223_v55 = vpop.eup %1222  ;;  %v886_v56 = vadd.f32 %v1096_v36, %v882_v51 }
0x10cf   :  { %931 = vrot.lane.b32.xlu2 %v1223_v55, %s1295_s0 }
0x10d0   :  { %1224 = vtanh.f32 %v886_v56  ;;  %v1060_v60 = vmul.f32 -1.442695, %v886_v56 }
0x10d1   :  { %1226 = vpow2.f32 %v1059_v37 }
0x10d6   :  { %v1225_v44 = vpop.eup %1224 }
0x10d7   :  { %933 = vrot.lane.b32.xlu0 %v1225_v44, %s1295_s0  ;;  %v1227_v58 = vpop.eup %1226 }
0x10d8   :  { %v893_v49 = vadd.f32 1.0, %v1227_v58 }
0x10da   :  { %1228 = vrcp.f32 %v893_v49  ;;  %v906_v45 = vand.u32 2147483648, %v893_v49  ;;  %vm900_vm12 = vweird.f32 %v893_v49  ;;  %v904_v54 = vand.u32 2147483647, %v893_v49 }
0x10db   :  { %1230 = vpow2.f32 %v1060_v60 }
0x10dc   :  { %v907_v3 = vor.u32 1.1754944e-38, %v906_v45  ;;  %vm905_vm14 = vcmp.eq.f32.partialorder %v904_v54, 8.507059e+37 }
0x10e0   :  { %v1229_v52 = vpop.eup %1228 }
0x10e1   :  { %v896_v40 = vmul.f32 %v1229_v52, %v893_v49  ;;  %vm901_vm11 = vweird.f32 %v1229_v52  ;;  %v1231_v1 = vpop.eup %1230 }
0x10e2   :  { %vm902_vm13 = vmor %vm900_vm12, %vm901_vm11  ;;  %v894_v59 = vadd.f32 1.0, %v1231_v1 }
0x10e3   :  { %v897_v42 = vsub.f32 1.0, %v896_v40 }
0x10e4   :  { %1232 = vrcp.f32 %v894_v59  ;;  %v921_v11 = vand.u32 2147483648, %v894_v59  ;;  %vm915_vm1 = vweird.f32 %v894_v59  ;;  %v919_v5 = vand.u32 2147483647, %v894_v59 }
0x10e5   :  { %v898_v62 = vmul.f32 %v1229_v52, %v897_v42 }
0x10e6   :  { %v922_v13 = vor.u32 1.1754944e-38, %v921_v11  ;;  %vm920_vm3 = vcmp.eq.f32.partialorder %v919_v5, 8.507059e+37 }
0x10e7   :  { %v899_v0 = vadd.f32 %v1229_v52, %v898_v62 }
0x10e9   :  { %v903_v2 = vsel %vm902_vm13, %v1229_v52, %v899_v0 }
0x10ea   :  { %v908_v6 = vsel %vm905_vm14, %v907_v3, %v903_v2  ;;  %v1233_v8 = vpop.eup %1232 }
0x10eb   :  { %v911_v57 = vmul.f32 %v1233_v8, %v894_v59  ;;  %vm916_vm15 = vweird.f32 %v1233_v8  ;;  %v927_v18 = vmul.f32 %v908_v6, %v857_v17 }
0x10ec   :  { %vm917_vm2 = vmor %vm915_vm1, %vm916_vm15 }
0x10ed   :  { %v912_v4 = vsub.f32 1.0, %v911_v57 }
0x10ef   :  { %v913_v9 = vmul.f32 %v1233_v8, %v912_v4 }
0x10f1   :  { %v914_v10 = vadd.f32 %v1233_v8, %v913_v9 }
0x10f3   :  { %v918_v12 = vsel %vm917_vm2, %v1233_v8, %v914_v10 }
0x10f4   :  { %v923_v15 = vsel %vm920_vm3, %v922_v13, %v918_v12 }
0x10f5   :  { %v928_v23 = vmul.f32 %v923_v15, %v858_v21 }
0x1129   :  { %v932_v53 = vpop.permute.xlu2 %931 }
0x112a   :  { %v937_v7 = vmul.f32 %v932_v53, %v908_v6 }
0x112c   :  { %941 = vrot.lane.b32.xlu1 %v937_v7, %s1294_s27 }
0x1149   :  { %v934_v14 = vpop.permute.xlu0 %933 }
0x114a   :  { %v938_v16 = vmul.f32 %v934_v14, %v923_v15 }
0x114c   :  { %943 = vrot.lane.b32.xlu2 %v938_v16, %s1294_s27 }
0x119e   :  { %v942_v19 = vpop.permute.xlu1 %941 }
0x119f   :  { %v947_v20 = vadd.f32 %v942_v19, %v927_v18 }
0x11a1   :  { %1234 = vtanh.f32 %v947_v20  ;;  %v967_v28 = vsel %vm1061_vm4, %v947_v20, %v857_v17 }
0x11a6   :  { %v944_v24 = vpop.permute.xlu2 %943 }
0x11a7   :  { %v1235_v26 = vpop.eup %1234  ;;  %v948_v29 = vadd.f32 %v944_v24, %v928_v23 }
0x11a8   :  { %953 = vrot.lane.b32.xlu0 %v1235_v26, %s1295_s0 }
0x11a9   :  { %1236 = vtanh.f32 %v948_v29  ;;  %v968_v35 = vsel %vm1062_vm5, %v948_v29, %v858_v21 }
0x11af   :  { %v1237_v31 = vpop.eup %1236 }
0x11b0   :  { %955 = vrot.lane.b32.xlu1 %v1237_v31, %s1295_s0 }
0x11b8   :  { %981 = vrot.lane.b32.xlu1 %v967_v28, %s1297_s29 }
0x121a   :  { %v954_v33 = vpop.permute.xlu0 %953 }
0x121b   :  { %v959_v34 = vmul.f32 %v954_v33, %v908_v6 }
0x121d   :  { %v965_v32 = vsel %vm1061_vm4, %v959_v34, %v1638_v27 }
0x121e   :  { %971 = vrot.lane.b32.xlu2 %v965_v32, %s1294_s27 }
0x1222   :  { %v956_v22 = vpop.permute.xlu1 %955 }
0x1223   :  { %v960_v25 = vmul.f32 %v956_v22, %v923_v15 }
0x1225   :  { %v966_v38 = vsel %vm1062_vm5, %v960_v25, %v1643_v30 }
0x1226   :  { %983 = vrot.lane.b32.xlu2 %v968_v35, %s1297_s29  ;;  %973 = vrot.lane.b32.xlu0 %v966_v38, %s1294_s27 }
0x122a   :  { %v982_v61 = vpop.permute.xlu1 %981 }
0x122b   :  { %987 = vst.msk [vmem:[#allocation3] sm:$0xff] %vm39_vm0, %v982_v61 }
0x1278   :  { %v972_v39 = vpop.permute.xlu2 %971 }
0x1279   :  { %977 = vst.msk [vmem:[#allocation2] sm:$0xff] %vm39_vm0, %v972_v39 }
0x1280   :  { %v984_v27 = vpop.permute.xlu2 %983 }
0x1281   :  { %988 = vst.msk [vmem:[#allocation3 + $0x8] sm:$0xff] %vm39_vm0, %v984_v27 }
0x1298   :  { %v974_v41 = vpop.permute.xlu0 %973 }
0x1299   :  { %978 = vst.msk [vmem:[#allocation2 + $0x8] sm:$0xff] %vm39_vm0, %v974_v41 }
0x129a PF:  { %s1000_s7 = sshll.u32 %s1684_s4, 4  ;;  %s1298_s8 = smov [#allocation9]   ;;  %s1001_s7 = int_to_ptr.hbm [resolvable:$true] %s1000_s7 }
0x129b   :  { %v989_v63 = vld [vmem:[#allocation2] sm:$0xff]  ;;  %s998_s9 = sshll.u32 %s1298_s8, 4  ;;  %s1299_s10 = smov 128   ;;  %s999_s9 = int_to_ptr.vmem [resolvable:$true] %s998_s9 }
0x129c   :  { %992 = vst.msk [vmem:[#allocation9] sm:$0xff] %vm39_vm0, %v989_v63  ;;  %s1300_s11 = smov 8  }
0x12a0   :  { %v990_v43 = vld [vmem:[#allocation2 + $0x8] sm:$0xff] }
0x12a1   :  { %993 = vst.msk [vmem:[#allocation9 + $0x8] sm:$0xff] %vm39_vm0, %v990_v43 }
0x12a2   :  { %1006 = dma.vmem_to_hbm [thread:$0]  %s999_s9, 256, %s1001_s7, [#allocation8], %s1299_s10, %s1299_s10, %s1300_s11  }
0x12a3   :  { %1288 = dma.done.wait [#allocation8], 256  }
0x12a4   :  { %1289 = vsyncadd [#allocation8], 4294967040 }
0x12a5   :  { %1011 = vsyncpa [#allocation7], 1 }
0x12a6   :  { %1012 = vsyncpa [#allocation8], 1 }

</bundles_post_ra>
